<compile_context>
chip_gen: v7x
topology: tpu7x:2x2x1
jax: 0.10.0
libtpu: 0.0.40
codegen_flags: <defaults>
</compile_context>

<pallas_src>
import functools

import jax
import jax.numpy as jnp
from jax.experimental import pallas as pl
from jax.experimental.pallas import tpu as pltpu

LANE = 128


def _round_up(x, m):
    return ((x + m - 1) // m) * m


def _vae_kernel(x_ref, eps_ref,
                w1_ref, b1_ref,
                whead_ref, bhead_ref,
                w3_ref, b3_ref,
                w4_ref, b4_ref,
                out_ref, stats_ref,
                *, latent_pad):
    """Fused VAE forward for one batch tile.

    x_ref:    [TM, D]   f32         w1_ref: [D, Hp]    bf16   b1_ref: [1, Hp]   f32
    eps_ref:  [TM, Lp]  f32         whead : [Hp, 2Lp]  f32    bhead : [1, 2Lp]  f32
                                    w3    : [Lp, Hp]   f32    b3    : [1, Hp]   f32
                                    w4    : [Hp, D]    bf16   b4    : [1, D]    f32
    out_ref:  [TM, D]   f32  (reconstruction, exact sigmoid via tanh)
    stats_ref:[TM, 2Lp] f32  (mu | logvar, each in its own 128-lane slab)
    All padded rows/cols of the weights/biases are exactly zero, so padded hidden
    units stay 0 through ReLU and padded latent lanes stay 0 through the
    reparameterization (exp(0)*0 == 0): results match the unpadded math bit-exactly.
    """
    # ---- encoder: fc1 + ReLU (bf16 weights, f32 accumulation on MXU) ----
    x = x_ref[...].astype(jnp.bfloat16)                        # [TM, D] bf16
    h = jnp.dot(x, w1_ref[...],
                preferred_element_type=jnp.float32) + b1_ref[...]
    h = jnp.maximum(h, 0.0)                                    # [TM, Hp] f32

    # ---- fused mu/logvar head: single matmul, lane-dense packed output ----
    stats = jnp.dot(h, whead_ref[...],
                    preferred_element_type=jnp.float32) + bhead_ref[...]
    mu = stats[:, :latent_pad]                                 # [TM, Lp] (vreg-aligned)
    logvar = stats[:, latent_pad:]                             # [TM, Lp]

    # ---- reparameterization: z = mu + exp(0.5*logvar) * eps ----
    z = mu + jnp.exp(0.5 * logvar) * eps_ref[...]              # [TM, Lp] f32

    # ---- decoder: fc + ReLU, then output projection (bf16 weights) ----
    h2 = jnp.dot(z, w3_ref[...],
                 preferred_element_type=jnp.float32) + b3_ref[...]
    h2 = jnp.maximum(h2, 0.0)                                  # [TM, Hp] f32

    logits = jnp.dot(h2.astype(jnp.bfloat16), w4_ref[...],
                     preferred_element_type=jnp.float32) + b4_ref[...]

    # Exact sigmoid with a single EUP transcendental per element (tanh form).
    out_ref[...] = 0.5 * jnp.tanh(0.5 * logits) + 0.5
    stats_ref[...] = stats


def _pick_tm(batch, d, hp, lp, single_buffer_weights,
             vmem_budget=40 * 1024 * 1024):
    """Fixed large batch tile; ragged last tile handled by the cdiv grid."""
    tm = 256
    if batch >= 16:
        # Guarantee >= 2 batch tiles so "parallel" actually shards across v7x's 2 TCs.
        tm = min(tm, _round_up(pl.cdiv(batch, 2), 8))
    tm = min(tm, _round_up(batch, 8))    # tiny batch: one (sublane-padded) tile
    tm = max(tm, 8)

    # VMEM budget (v7x has 64 MiB/core): double-buffered per-tile I/O + resident weights.
    wmul = 1 if single_buffer_weights else 2
    weight_bytes = wmul * (d * hp * 2          # w1 bf16
                           + hp * 2 * lp * 4   # whead f32
                           + lp * hp * 4       # w3 f32
                           + hp * d * 2        # w4 bf16
                           + (hp + 2 * lp + hp + d) * 4)  # biases f32

    def io_bytes(t):
        return 2 * t * (d * 4 + lp * 4) + 2 * t * (d * 4 + 2 * lp * 4)

    while tm > 8 and io_bytes(tm) + weight_bytes > vmem_budget:
        tm //= 2
    tm = max(8, _round_up(tm, 8))
    return tm, io_bytes(tm) + weight_bytes


def prepare_params(params):
    """Pad hidden/latent widths to lane-dense multiples of 128 (zeros), fuse the
    mu/logvar heads into one packed matmul, and cast the two large weights to bf16.
    Returns (prepared_params, latent, latent_pad)."""
    (w1, b1, wmu, bmu, wlv, blv, w3, b3, w4, b4) = params
    d, hidden = w1.shape
    latent = wmu.shape[1]
    hp = _round_up(hidden, LANE)
    lp = _round_up(latent, LANE)

    def pad2(a, rows, cols):
        return jnp.pad(a, ((0, rows - a.shape[0]), (0, cols - a.shape[1])))

    w1p = pad2(w1, d, hp).astype(jnp.bfloat16)                 # [D, Hp] bf16
    b1p = pad2(b1, 1, hp)                                      # [1, Hp]
    whead = jnp.concatenate([pad2(wmu, hp, lp),
                             pad2(wlv, hp, lp)], axis=1)       # [Hp, 2Lp]
    bhead = jnp.concatenate([pad2(bmu, 1, lp),
                             pad2(blv, 1, lp)], axis=1)        # [1, 2Lp]
    w3p = pad2(w3, lp, hp)                                     # [Lp, Hp]
    b3p = pad2(b3, 1, hp)                                      # [1, Hp]
    w4p = pad2(w4, hp, d).astype(jnp.bfloat16)                 # [Hp, D] bf16
    prepared = (w1p, b1p, whead, bhead, w3p, b3p, w4p, b4)
    return prepared, latent, lp


@functools.partial(jax.jit, static_argnames=("latent", "single_buffer_weights"))
def vae_forward(x_nchw, eps, prepared, *, latent, single_buffer_weights=True):
    """x_nchw: [B, C, H, W] f32.  Returns (recon [B,C,H,W], mu [B,L], logvar [B,L])."""
    (w1, b1, whead, bhead, w3, b3, w4, b4) = prepared
    B, C, H, W = x_nchw.shape
    D = C * H * W
    hp = w1.shape[1]
    lp = whead.shape[1] // 2

    x_flat = x_nchw.reshape(B, D)
    # eps is tiny ([B, L]); pad to the latent lane slab so the in-kernel
    # reparameterization is lane-dense (padded lanes are exactly zero).
    eps_p = jnp.pad(eps, ((0, 0), (0, lp - eps.shape[1])))

    TM, vmem_est = _pick_tm(B, D, hp, lp, single_buffer_weights)
    grid = (pl.cdiv(B, TM),)
    vmem_limit = int(max(vmem_est + (8 << 20), 32 << 20))

    def resident(a):
        # Weights/biases: same block for every grid index -> stay VMEM-resident.
        if single_buffer_weights:
            return pl.BlockSpec(a.shape, lambda i: (0, 0),
                                pipeline_mode=pl.Buffered(1))
        return pl.BlockSpec(a.shape, lambda i: (0, 0))

    in_specs = [
        pl.BlockSpec((TM, D), lambda i: (i, 0)),        # x tile
        pl.BlockSpec((TM, lp), lambda i: (i, 0)),       # eps tile
        resident(w1), resident(b1),
        resident(whead), resident(bhead),
        resident(w3), resident(b3),
        resident(w4), resident(b4),
    ]
    out_shapes = (
        jax.ShapeDtypeStruct((B, D), jnp.float32),          # reconstruction (flat)
        jax.ShapeDtypeStruct((B, 2 * lp), jnp.float32),     # packed mu|logvar (padded)
    )
    out_specs = (
        pl.BlockSpec((TM, D), lambda i: (i, 0)),
        pl.BlockSpec((TM, 2 * lp), lambda i: (i, 0)),
    )

    kernel = functools.partial(_vae_kernel, latent_pad=lp)

    recon_flat, stats = pl.pallas_call(
        kernel,
        grid=grid,
        in_specs=in_specs,
        out_specs=out_specs,
        out_shape=out_shapes,
        compiler_params=pltpu.CompilerParams(
            # Batch tiles are independent -> shard across TCs on v7x.
            dimension_semantics=("parallel",),
            vmem_limit_bytes=vmem_limit),
    )(x_flat, eps_p, w1, b1, whead, bhead, w3, b3, w4, b4)

    mu = stats[:, :latent]
    logvar = stats[:, lp:lp + latent]
    return recon_flat.reshape(B, C, H, W), mu, logvar


def init_params(key, in_dim, hidden, latent):
    """Deterministic small-scale Xavier-ish init for the synthetic VAE (f32)."""
    ks = jax.random.split(key, 5)

    def lin(k, fan_in, fan_out):
        scale = 1.0 / jnp.sqrt(jnp.float32(fan_in))
        w = jax.random.normal(k, (fan_in, fan_out), jnp.float32) * scale
        b = jnp.zeros((1, fan_out), jnp.float32)   # kept 2-D for TPU-friendly layout
        return w, b

    w1, b1 = lin(ks[0], in_dim, hidden)      # encoder fc1
    wmu, bmu = lin(ks[1], hidden, latent)    # mu head
    wlv, blv = lin(ks[2], hidden, latent)    # logvar head
    w3, b3 = lin(ks[3], latent, hidden)      # decoder fc1
    w4, b4 = lin(ks[4], hidden, in_dim)      # decoder output
    return (w1, b1, wmu, bmu, wlv, blv, w3, b3, w4, b4)


def _reference(x_nchw, eps, prepared, latent):
    """Plain-JAX reference using the SAME prepared (padded + bf16) params."""
    (w1, b1, whead, bhead, w3, b3, w4, b4) = prepared
    lp = whead.shape[1] // 2
    B = x_nchw.shape[0]
    x = x_nchw.reshape(B, -1)
    eps_p = jnp.pad(eps, ((0, 0), (0, lp - eps.shape[1])))

    h = jnp.maximum(jnp.dot(x.astype(jnp.bfloat16), w1,
                            preferred_element_type=jnp.float32) + b1, 0.0)
    stats = jnp.dot(h, whead, preferred_element_type=jnp.float32) + bhead
    mu_p, logvar_p = stats[:, :lp], stats[:, lp:]
    z = mu_p + jnp.exp(0.5 * logvar_p) * eps_p
    h2 = jnp.maximum(jnp.dot(z, w3, preferred_element_type=jnp.float32) + b3, 0.0)
    logits = jnp.dot(h2.astype(jnp.bfloat16), w4,
                     preferred_element_type=jnp.float32) + b4
    out = jax.nn.sigmoid(logits)
    return out.reshape(x_nchw.shape), mu_p[:, :latent], logvar_p[:, :latent]


if __name__ == "__main__":
    key = jax.random.PRNGKey(0)
    k_x, k_eps, k_p = jax.random.split(key, 3)

    B, C, H, W = 2, 4, 16, 16          # small NCHW input
    HIDDEN, LATENT = 32, 16
    D = C * H * W

    x = jax.random.normal(k_x, (B, C, H, W), jnp.float32)
    eps = jax.random.normal(k_eps, (B, LATENT), jnp.float32)
    params = init_params(k_p, D, HIDDEN, LATENT)

    prepared, latent, _lp = prepare_params(params)

    try:
        recon, mu, logvar = jax.block_until_ready(
            vae_forward(x, eps, prepared, latent=latent,
                        single_buffer_weights=True))
    except Exception:
        # TODO(synk): pl.Buffered(1) single-buffering rejected on this jax build;
        # falling back to default double-buffered resident weights.
        recon, mu, logvar = jax.block_until_ready(
            vae_forward(x, eps, prepared, latent=latent,
                        single_buffer_weights=False))

    # Lightweight correctness check against pure-JAX reference (same padded bf16
    # params); kernel uses the exact tanh-form sigmoid, so tolerances are tight.
    r_ref, mu_ref, lv_ref = _reference(x, eps, prepared, latent)
    assert recon.shape == (B, C, H, W)
    assert mu.shape == (B, LATENT) and logvar.shape == (B, LATENT)
    assert jnp.allclose(recon, r_ref, atol=5e-3, rtol=5e-3)
    assert jnp.allclose(mu, mu_ref, atol=2e-3, rtol=2e-3)
    assert jnp.allclose(logvar, lv_ref, atol=2e-3, rtol=2e-3)

    print("KERNEL_OK")
</pallas_src>

<mosaic_0001>
module attributes {stable_mosaic.version = 11 : i64} {
  func.func @_vae_kernel(%arg0: i32, %arg1: memref<8x1024xf32, #tpu.memory_space<vmem>>, %arg2: memref<8x128xf32, #tpu.memory_space<vmem>>, %arg3: memref<1024x128xbf16, #tpu.memory_space<vmem>>, %arg4: memref<1x128xf32, #tpu.memory_space<vmem>>, %arg5: memref<128x256xf32, #tpu.memory_space<vmem>>, %arg6: memref<1x256xf32, #tpu.memory_space<vmem>>, %arg7: memref<128x128xf32, #tpu.memory_space<vmem>>, %arg8: memref<1x128xf32, #tpu.memory_space<vmem>>, %arg9: memref<128x1024xbf16, #tpu.memory_space<vmem>>, %arg10: memref<1x1024xf32, #tpu.memory_space<vmem>>, %arg11: memref<8x1024xf32, #tpu.memory_space<vmem>>, %arg12: memref<8x256xf32, #tpu.memory_space<vmem>>) attributes {dimension_semantics = [#tpu.dimension_semantics<parallel>], iteration_bounds = array<i64: 1>, scalar_prefetch = 0 : i64, scratch_operands = 0 : i64, tpu.core_type = #tpu.core_type<tc>, window_params = [{transform_indices = @transform_0, window_bounds = array<i64: 8, 1024>}, {transform_indices = @transform_1, window_bounds = array<i64: 8, 128>}, {pipeline_mode = #tpu.pipeline_mode<synchronous>, transform_indices = @transform_2, window_bounds = array<i64: 1024, 128>}, {pipeline_mode = #tpu.pipeline_mode<synchronous>, transform_indices = @transform_3, window_bounds = array<i64: 1, 128>}, {pipeline_mode = #tpu.pipeline_mode<synchronous>, transform_indices = @transform_4, window_bounds = array<i64: 128, 256>}, {pipeline_mode = #tpu.pipeline_mode<synchronous>, transform_indices = @transform_5, window_bounds = array<i64: 1, 256>}, {pipeline_mode = #tpu.pipeline_mode<synchronous>, transform_indices = @transform_6, window_bounds = array<i64: 128, 128>}, {pipeline_mode = #tpu.pipeline_mode<synchronous>, transform_indices = @transform_7, window_bounds = array<i64: 1, 128>}, {pipeline_mode = #tpu.pipeline_mode<synchronous>, transform_indices = @transform_8, window_bounds = array<i64: 128, 1024>}, {pipeline_mode = #tpu.pipeline_mode<synchronous>, transform_indices = @transform_9, window_bounds = array<i64: 1, 1024>}, {transform_indices = @transform_10, window_bounds = array<i64: 8, 1024>}, {transform_indices = @transform_11, window_bounds = array<i64: 8, 256>}]} {
    %c0 = arith.constant 0 : index
    %c0_0 = arith.constant 0 : index
    %0 = vector.load %arg1[%c0, %c0_0] : memref<8x1024xf32, #tpu.memory_space<vmem>>, vector<8x1024xf32>
    %1 = arith.truncf %0 : vector<8x1024xf32> to vector<8x1024xbf16>
    %c0_1 = arith.constant 0 : index
    %c0_2 = arith.constant 0 : index
    %2 = vector.load %arg3[%c0_1, %c0_2] : memref<1024x128xbf16, #tpu.memory_space<vmem>>, vector<1024x128xbf16>
    %cst = arith.constant dense<0.000000e+00> : vector<8x128xf32>
    %3 = tpu.matmul %1, %2, %cst {dimension_numbers = #tpu.dot_dimension_numbers<[1], [0], [0], [1], [0, 0, 1, 1], [], []>} : vector<8x1024xbf16>, vector<1024x128xbf16>, vector<8x128xf32> -> vector<8x128xf32>
    %c0_3 = arith.constant 0 : index
    %c0_4 = arith.constant 0 : index
    %4 = vector.load %arg4[%c0_3, %c0_4] : memref<1x128xf32, #tpu.memory_space<vmem>>, vector<1x128xf32>
    %5 = vector.broadcast %4 : vector<1x128xf32> to vector<8x128xf32>
    %6 = arith.addf %3, %5 : vector<8x128xf32>
    %cst_5 = arith.constant 0.000000e+00 : f32
    %7 = vector.broadcast %cst_5 : f32 to vector<8x128xf32>
    %8 = arith.maximumf %6, %7 : vector<8x128xf32>
    %c0_6 = arith.constant 0 : index
    %c0_7 = arith.constant 0 : index
    %9 = vector.load %arg5[%c0_6, %c0_7] : memref<128x256xf32, #tpu.memory_space<vmem>>, vector<128x256xf32>
    %cst_8 = arith.constant dense<0.000000e+00> : vector<8x256xf32>
    %10 = tpu.matmul %8, %9, %cst_8 {dimension_numbers = #tpu.dot_dimension_numbers<[1], [0], [0], [1], [0, 0, 1, 1], [], []>} : vector<8x128xf32>, vector<128x256xf32>, vector<8x256xf32> -> vector<8x256xf32>
    %c0_9 = arith.constant 0 : index
    %c0_10 = arith.constant 0 : index
    %11 = vector.load %arg6[%c0_9, %c0_10] : memref<1x256xf32, #tpu.memory_space<vmem>>, vector<1x256xf32>
    %12 = vector.broadcast %11 : vector<1x256xf32> to vector<8x256xf32>
    %13 = arith.addf %10, %12 : vector<8x256xf32>
    %14 = vector.extract_strided_slice %13 {offsets = [0, 0], sizes = [8, 128], strides = [1, 1]} : vector<8x256xf32> to vector<8x128xf32>
    %15 = vector.extract_strided_slice %13 {offsets = [0, 128], sizes = [8, 128], strides = [1, 1]} : vector<8x256xf32> to vector<8x128xf32>
    %cst_11 = arith.constant 5.000000e-01 : f32
    %16 = vector.broadcast %cst_11 : f32 to vector<8x128xf32>
    %17 = arith.mulf %16, %15 : vector<8x128xf32>
    %18 = math.exp %17 : vector<8x128xf32>
    %c0_12 = arith.constant 0 : index
    %c0_13 = arith.constant 0 : index
    %19 = vector.load %arg2[%c0_12, %c0_13] : memref<8x128xf32, #tpu.memory_space<vmem>>, vector<8x128xf32>
    %20 = arith.mulf %18, %19 : vector<8x128xf32>
    %21 = arith.addf %14, %20 : vector<8x128xf32>
    %c0_14 = arith.constant 0 : index
    %c0_15 = arith.constant 0 : index
    %22 = vector.load %arg7[%c0_14, %c0_15] : memref<128x128xf32, #tpu.memory_space<vmem>>, vector<128x128xf32>
    %cst_16 = arith.constant dense<0.000000e+00> : vector<8x128xf32>
    %23 = tpu.matmul %21, %22, %cst_16 {dimension_numbers = #tpu.dot_dimension_numbers<[1], [0], [0], [1], [0, 0, 1, 1], [], []>} : vector<8x128xf32>, vector<128x128xf32>, vector<8x128xf32> -> vector<8x128xf32>
    %c0_17 = arith.constant 0 : index
    %c0_18 = arith.constant 0 : index
    %24 = vector.load %arg8[%c0_17, %c0_18] : memref<1x128xf32, #tpu.memory_space<vmem>>, vector<1x128xf32>
    %25 = vector.broadcast %24 : vector<1x128xf32> to vector<8x128xf32>
    %26 = arith.addf %23, %25 : vector<8x128xf32>
    %cst_19 = arith.constant 0.000000e+00 : f32
    %27 = vector.broadcast %cst_19 : f32 to vector<8x128xf32>
    %28 = arith.maximumf %26, %27 : vector<8x128xf32>
    %29 = arith.truncf %28 : vector<8x128xf32> to vector<8x128xbf16>
    %c0_20 = arith.constant 0 : index
    %c0_21 = arith.constant 0 : index
    %30 = vector.load %arg9[%c0_20, %c0_21] : memref<128x1024xbf16, #tpu.memory_space<vmem>>, vector<128x1024xbf16>
    %cst_22 = arith.constant dense<0.000000e+00> : vector<8x1024xf32>
    %31 = tpu.matmul %29, %30, %cst_22 {dimension_numbers = #tpu.dot_dimension_numbers<[1], [0], [0], [1], [0, 0, 1, 1], [], []>} : vector<8x128xbf16>, vector<128x1024xbf16>, vector<8x1024xf32> -> vector<8x1024xf32>
    %c0_23 = arith.constant 0 : index
    %c0_24 = arith.constant 0 : index
    %32 = vector.load %arg10[%c0_23, %c0_24] : memref<1x1024xf32, #tpu.memory_space<vmem>>, vector<1x1024xf32>
    %33 = vector.broadcast %32 : vector<1x1024xf32> to vector<8x1024xf32>
    %34 = arith.addf %31, %33 : vector<8x1024xf32>
    %cst_25 = arith.constant 5.000000e-01 : f32
    %35 = vector.broadcast %cst_25 : f32 to vector<8x1024xf32>
    %36 = arith.mulf %35, %34 : vector<8x1024xf32>
    %37 = math.tanh %36 : vector<8x1024xf32>
    %cst_26 = arith.constant 5.000000e-01 : f32
    %38 = vector.broadcast %cst_26 : f32 to vector<8x1024xf32>
    %39 = arith.mulf %38, %37 : vector<8x1024xf32>
    %cst_27 = arith.constant 5.000000e-01 : f32
    %40 = vector.broadcast %cst_27 : f32 to vector<8x1024xf32>
    %41 = arith.addf %39, %40 : vector<8x1024xf32>
    %c0_28 = arith.constant 0 : index
    %c0_29 = arith.constant 0 : index
    %42 = vector.load %arg11[%c0_28, %c0_29] : memref<8x1024xf32, #tpu.memory_space<vmem>>, vector<8x1024xf32>
    tpu.vector_store %arg11[%c0_28, %c0_29], %41 {strides = array<i32>} : memref<8x1024xf32, #tpu.memory_space<vmem>>, vector<8x1024xf32>,
    %c0_30 = arith.constant 0 : index
    %c0_31 = arith.constant 0 : index
    %43 = vector.load %arg12[%c0_30, %c0_31] : memref<8x256xf32, #tpu.memory_space<vmem>>, vector<8x256xf32>
    tpu.vector_store %arg12[%c0_30, %c0_31], %13 {strides = array<i32>} : memref<8x256xf32, #tpu.memory_space<vmem>>, vector<8x256xf32>,
    return
  }
  func.func @transform_0(%arg0: i32) -> (i32, i32) {
    %c0_i32 = arith.constant 0 : i32
    %c0_i32_0 = arith.constant 0 : i32
    return %arg0, %c0_i32 : i32, i32
  }
  func.func @transform_1(%arg0: i32) -> (i32, i32) {
    %c0_i32 = arith.constant 0 : i32
    %c0_i32_0 = arith.constant 0 : i32
    return %arg0, %c0_i32 : i32, i32
  }
  func.func @transform_2(%arg0: i32) -> (i32, i32) {
    %c0_i32 = arith.constant 0 : i32
    %c0_i32_0 = arith.constant 0 : i32
    %c0_i32_1 = arith.constant 0 : i32
    return %c0_i32, %c0_i32_0 : i32, i32
  }
  func.func @transform_3(%arg0: i32) -> (i32, i32) {
    %c0_i32 = arith.constant 0 : i32
    %c0_i32_0 = arith.constant 0 : i32
    %c0_i32_1 = arith.constant 0 : i32
    return %c0_i32, %c0_i32_0 : i32, i32
  }
  func.func @transform_4(%arg0: i32) -> (i32, i32) {
    %c0_i32 = arith.constant 0 : i32
    %c0_i32_0 = arith.constant 0 : i32
    %c0_i32_1 = arith.constant 0 : i32
    return %c0_i32, %c0_i32_0 : i32, i32
  }
  func.func @transform_5(%arg0: i32) -> (i32, i32) {
    %c0_i32 = arith.constant 0 : i32
    %c0_i32_0 = arith.constant 0 : i32
    %c0_i32_1 = arith.constant 0 : i32
    return %c0_i32, %c0_i32_0 : i32, i32
  }
  func.func @transform_6(%arg0: i32) -> (i32, i32) {
    %c0_i32 = arith.constant 0 : i32
    %c0_i32_0 = arith.constant 0 : i32
    %c0_i32_1 = arith.constant 0 : i32
    return %c0_i32, %c0_i32_0 : i32, i32
  }
  func.func @transform_7(%arg0: i32) -> (i32, i32) {
    %c0_i32 = arith.constant 0 : i32
    %c0_i32_0 = arith.constant 0 : i32
    %c0_i32_1 = arith.constant 0 : i32
    return %c0_i32, %c0_i32_0 : i32, i32
  }
  func.func @transform_8(%arg0: i32) -> (i32, i32) {
    %c0_i32 = arith.constant 0 : i32
    %c0_i32_0 = arith.constant 0 : i32
    %c0_i32_1 = arith.constant 0 : i32
    return %c0_i32, %c0_i32_0 : i32, i32
  }
  func.func @transform_9(%arg0: i32) -> (i32, i32) {
    %c0_i32 = arith.constant 0 : i32
    %c0_i32_0 = arith.constant 0 : i32
    %c0_i32_1 = arith.constant 0 : i32
    return %c0_i32, %c0_i32_0 : i32, i32
  }
  func.func @transform_10(%arg0: i32) -> (i32, i32) {
    %c0_i32 = arith.constant 0 : i32
    %c0_i32_0 = arith.constant 0 : i32
    return %arg0, %c0_i32 : i32, i32
  }
  func.func @transform_11(%arg0: i32) -> (i32, i32) {
    %c0_i32 = arith.constant 0 : i32
    %c0_i32_0 = arith.constant 0 : i32
    return %arg0, %c0_i32 : i32, i32
  }
}

module attributes {stable_mosaic.version = 11 : i64} {
  func.func @_vae_kernel(%arg0: i32, %arg1: memref<8x1024xf32, #tpu.memory_space<vmem>>, %arg2: memref<8x128xf32, #tpu.memory_space<vmem>>, %arg3: memref<1024x128xbf16, #tpu.memory_space<vmem>>, %arg4: memref<1x128xf32, #tpu.memory_space<vmem>>, %arg5: memref<128x256xf32, #tpu.memory_space<vmem>>, %arg6: memref<1x256xf32, #tpu.memory_space<vmem>>, %arg7: memref<128x128xf32, #tpu.memory_space<vmem>>, %arg8: memref<1x128xf32, #tpu.memory_space<vmem>>, %arg9: memref<128x1024xbf16, #tpu.memory_space<vmem>>, %arg10: memref<1x1024xf32, #tpu.memory_space<vmem>>, %arg11: memref<8x1024xf32, #tpu.memory_space<vmem>>, %arg12: memref<8x256xf32, #tpu.memory_space<vmem>>) attributes {dimension_semantics = [#tpu.dimension_semantics<parallel>], iteration_bounds = array<i64: 1>, scalar_prefetch = 0 : i64, scratch_operands = 0 : i64, tpu.core_type = #tpu.core_type<tc>, window_params = [{transform_indices = @transform_0, window_bounds = array<i64: 8, 1024>}, {transform_indices = @transform_1, window_bounds = array<i64: 8, 128>}, {pipeline_mode = #tpu.pipeline_mode<synchronous>, transform_indices = @transform_2, window_bounds = array<i64: 1024, 128>}, {pipeline_mode = #tpu.pipeline_mode<synchronous>, transform_indices = @transform_3, window_bounds = array<i64: 1, 128>}, {pipeline_mode = #tpu.pipeline_mode<synchronous>, transform_indices = @transform_4, window_bounds = array<i64: 128, 256>}, {pipeline_mode = #tpu.pipeline_mode<synchronous>, transform_indices = @transform_5, window_bounds = array<i64: 1, 256>}, {pipeline_mode = #tpu.pipeline_mode<synchronous>, transform_indices = @transform_6, window_bounds = array<i64: 128, 128>}, {pipeline_mode = #tpu.pipeline_mode<synchronous>, transform_indices = @transform_7, window_bounds = array<i64: 1, 128>}, {pipeline_mode = #tpu.pipeline_mode<synchronous>, transform_indices = @transform_8, window_bounds = array<i64: 128, 1024>}, {pipeline_mode = #tpu.pipeline_mode<synchronous>, transform_indices = @transform_9, window_bounds = array<i64: 1, 1024>}, {transform_indices = @transform_10, window_bounds = array<i64: 8, 1024>}, {transform_indices = @transform_11, window_bounds = array<i64: 8, 256>}]} {
    %c0 = arith.constant 0 : index
    %c0_0 = arith.constant 0 : index
    %0 = vector.load %arg1[%c0, %c0_0] : memref<8x1024xf32, #tpu.memory_space<vmem>>, vector<8x1024xf32>
    %1 = arith.truncf %0 : vector<8x1024xf32> to vector<8x1024xbf16>
    %c0_1 = arith.constant 0 : index
    %c0_2 = arith.constant 0 : index
    %2 = vector.load %arg3[%c0_1, %c0_2] : memref<1024x128xbf16, #tpu.memory_space<vmem>>, vector<1024x128xbf16>
    %cst = arith.constant dense<0.000000e+00> : vector<8x128xf32>
    %3 = tpu.matmul %1, %2, %cst {dimension_numbers = #tpu.dot_dimension_numbers<[1], [0], [0], [1], [0, 0, 1, 1], [], []>} : vector<8x1024xbf16>, vector<1024x128xbf16>, vector<8x128xf32> -> vector<8x128xf32>
    %c0_3 = arith.constant 0 : index
    %c0_4 = arith.constant 0 : index
    %4 = vector.load %arg4[%c0_3, %c0_4] : memref<1x128xf32, #tpu.memory_space<vmem>>, vector<1x128xf32>
    %5 = vector.broadcast %4 : vector<1x128xf32> to vector<8x128xf32>
    %6 = arith.addf %3, %5 : vector<8x128xf32>
    %cst_5 = arith.constant 0.000000e+00 : f32
    %7 = vector.broadcast %cst_5 : f32 to vector<8x128xf32>
    %8 = arith.maximumf %6, %7 : vector<8x128xf32>
    %c0_6 = arith.constant 0 : index
    %c0_7 = arith.constant 0 : index
    %9 = vector.load %arg5[%c0_6, %c0_7] : memref<128x256xf32, #tpu.memory_space<vmem>>, vector<128x256xf32>
    %cst_8 = arith.constant dense<0.000000e+00> : vector<8x256xf32>
    %10 = tpu.matmul %8, %9, %cst_8 {dimension_numbers = #tpu.dot_dimension_numbers<[1], [0], [0], [1], [0, 0, 1, 1], [], []>} : vector<8x128xf32>, vector<128x256xf32>, vector<8x256xf32> -> vector<8x256xf32>
    %c0_9 = arith.constant 0 : index
    %c0_10 = arith.constant 0 : index
    %11 = vector.load %arg6[%c0_9, %c0_10] : memref<1x256xf32, #tpu.memory_space<vmem>>, vector<1x256xf32>
    %12 = vector.broadcast %11 : vector<1x256xf32> to vector<8x256xf32>
    %13 = arith.addf %10, %12 : vector<8x256xf32>
    %14 = vector.extract_strided_slice %13 {offsets = [0, 0], sizes = [8, 128], strides = [1, 1]} : vector<8x256xf32> to vector<8x128xf32>
    %15 = vector.extract_strided_slice %13 {offsets = [0, 128], sizes = [8, 128], strides = [1, 1]} : vector<8x256xf32> to vector<8x128xf32>
    %cst_11 = arith.constant 5.000000e-01 : f32
    %16 = vector.broadcast %cst_11 : f32 to vector<8x128xf32>
    %17 = arith.mulf %16, %15 : vector<8x128xf32>
    %18 = math.exp %17 : vector<8x128xf32>
    %c0_12 = arith.constant 0 : index
    %c0_13 = arith.constant 0 : index
    %19 = vector.load %arg2[%c0_12, %c0_13] : memref<8x128xf32, #tpu.memory_space<vmem>>, vector<8x128xf32>
    %20 = arith.mulf %18, %19 : vector<8x128xf32>
    %21 = arith.addf %14, %20 : vector<8x128xf32>
    %c0_14 = arith.constant 0 : index
    %c0_15 = arith.constant 0 : index
    %22 = vector.load %arg7[%c0_14, %c0_15] : memref<128x128xf32, #tpu.memory_space<vmem>>, vector<128x128xf32>
    %cst_16 = arith.constant dense<0.000000e+00> : vector<8x128xf32>
    %23 = tpu.matmul %21, %22, %cst_16 {dimension_numbers = #tpu.dot_dimension_numbers<[1], [0], [0], [1], [0, 0, 1, 1], [], []>} : vector<8x128xf32>, vector<128x128xf32>, vector<8x128xf32> -> vector<8x128xf32>
    %c0_17 = arith.constant 0 : index
    %c0_18 = arith.constant 0 : index
    %24 = vector.load %arg8[%c0_17, %c0_18] : memref<1x128xf32, #tpu.memory_space<vmem>>, vector<1x128xf32>
    %25 = vector.broadcast %24 : vector<1x128xf32> to vector<8x128xf32>
    %26 = arith.addf %23, %25 : vector<8x128xf32>
    %cst_19 = arith.constant 0.000000e+00 : f32
    %27 = vector.broadcast %cst_19 : f32 to vector<8x128xf32>
    %28 = arith.maximumf %26, %27 : vector<8x128xf32>
    %29 = arith.truncf %28 : vector<8x128xf32> to vector<8x128xbf16>
    %c0_20 = arith.constant 0 : index
    %c0_21 = arith.constant 0 : index
    %30 = vector.load %arg9[%c0_20, %c0_21] : memref<128x1024xbf16, #tpu.memory_space<vmem>>, vector<128x1024xbf16>
    %cst_22 = arith.constant dense<0.000000e+00> : vector<8x1024xf32>
    %31 = tpu.matmul %29, %30, %cst_22 {dimension_numbers = #tpu.dot_dimension_numbers<[1], [0], [0], [1], [0, 0, 1, 1], [], []>} : vector<8x128xbf16>, vector<128x1024xbf16>, vector<8x1024xf32> -> vector<8x1024xf32>
    %c0_23 = arith.constant 0 : index
    %c0_24 = arith.constant 0 : index
    %32 = vector.load %arg10[%c0_23, %c0_24] : memref<1x1024xf32, #tpu.memory_space<vmem>>, vector<1x1024xf32>
    %33 = vector.broadcast %32 : vector<1x1024xf32> to vector<8x1024xf32>
    %34 = arith.addf %31, %33 : vector<8x1024xf32>
    %cst_25 = arith.constant 5.000000e-01 : f32
    %35 = vector.broadcast %cst_25 : f32 to vector<8x1024xf32>
    %36 = arith.mulf %35, %34 : vector<8x1024xf32>
    %37 = math.tanh %36 : vector<8x1024xf32>
    %cst_26 = arith.constant 5.000000e-01 : f32
    %38 = vector.broadcast %cst_26 : f32 to vector<8x1024xf32>
    %39 = arith.mulf %38, %37 : vector<8x1024xf32>
    %cst_27 = arith.constant 5.000000e-01 : f32
    %40 = vector.broadcast %cst_27 : f32 to vector<8x1024xf32>
    %41 = arith.addf %39, %40 : vector<8x1024xf32>
    %c0_28 = arith.constant 0 : index
    %c0_29 = arith.constant 0 : index
    %42 = vector.load %arg11[%c0_28, %c0_29] : memref<8x1024xf32, #tpu.memory_space<vmem>>, vector<8x1024xf32>
    tpu.vector_store %arg11[%c0_28, %c0_29], %41 {strides = array<i32>} : memref<8x1024xf32, #tpu.memory_space<vmem>>, vector<8x1024xf32>,
    %c0_30 = arith.constant 0 : index
    %c0_31 = arith.constant 0 : index
    %43 = vector.load %arg12[%c0_30, %c0_31] : memref<8x256xf32, #tpu.memory_space<vmem>>, vector<8x256xf32>
    tpu.vector_store %arg12[%c0_30, %c0_31], %13 {strides = array<i32>} : memref<8x256xf32, #tpu.memory_space<vmem>>, vector<8x256xf32>,
    return
  }
  func.func @transform_0(%arg0: i32) -> (i32, i32) {
    %c0_i32 = arith.constant 0 : i32
    %c0_i32_0 = arith.constant 0 : i32
    return %arg0, %c0_i32 : i32, i32
  }
  func.func @transform_1(%arg0: i32) -> (i32, i32) {
    %c0_i32 = arith.constant 0 : i32
    %c0_i32_0 = arith.constant 0 : i32
    return %arg0, %c0_i32 : i32, i32
  }
  func.func @transform_2(%arg0: i32) -> (i32, i32) {
    %c0_i32 = arith.constant 0 : i32
    %c0_i32_0 = arith.constant 0 : i32
    %c0_i32_1 = arith.constant 0 : i32
    return %c0_i32, %c0_i32_0 : i32, i32
  }
  func.func @transform_3(%arg0: i32) -> (i32, i32) {
    %c0_i32 = arith.constant 0 : i32
    %c0_i32_0 = arith.constant 0 : i32
    %c0_i32_1 = arith.constant 0 : i32
    return %c0_i32, %c0_i32_0 : i32, i32
  }
  func.func @transform_4(%arg0: i32) -> (i32, i32) {
    %c0_i32 = arith.constant 0 : i32
    %c0_i32_0 = arith.constant 0 : i32
    %c0_i32_1 = arith.constant 0 : i32
    return %c0_i32, %c0_i32_0 : i32, i32
  }
  func.func @transform_5(%arg0: i32) -> (i32, i32) {
    %c0_i32 = arith.constant 0 : i32
    %c0_i32_0 = arith.constant 0 : i32
    %c0_i32_1 = arith.constant 0 : i32
    return %c0_i32, %c0_i32_0 : i32, i32
  }
  func.func @transform_6(%arg0: i32) -> (i32, i32) {
    %c0_i32 = arith.constant 0 : i32
    %c0_i32_0 = arith.constant 0 : i32
    %c0_i32_1 = arith.constant 0 : i32
    return %c0_i32, %c0_i32_0 : i32, i32
  }
  func.func @transform_7(%arg0: i32) -> (i32, i32) {
    %c0_i32 = arith.constant 0 : i32
    %c0_i32_0 = arith.constant 0 : i32
    %c0_i32_1 = arith.constant 0 : i32
    return %c0_i32, %c0_i32_0 : i32, i32
  }
  func.func @transform_8(%arg0: i32) -> (i32, i32) {
    %c0_i32 = arith.constant 0 : i32
    %c0_i32_0 = arith.constant 0 : i32
    %c0_i32_1 = arith.constant 0 : i32
    return %c0_i32, %c0_i32_0 : i32, i32
  }
  func.func @transform_9(%arg0: i32) -> (i32, i32) {
    %c0_i32 = arith.constant 0 : i32
    %c0_i32_0 = arith.constant 0 : i32
    %c0_i32_1 = arith.constant 0 : i32
    return %c0_i32, %c0_i32_0 : i32, i32
  }
  func.func @transform_10(%arg0: i32) -> (i32, i32) {
    %c0_i32 = arith.constant 0 : i32
    %c0_i32_0 = arith.constant 0 : i32
    return %arg0, %c0_i32 : i32, i32
  }
  func.func @transform_11(%arg0: i32) -> (i32, i32) {
    %c0_i32 = arith.constant 0 : i32
    %c0_i32_0 = arith.constant 0 : i32
    return %arg0, %c0_i32 : i32, i32
  }
}

</mosaic_0001>

<bundles_post_ra>
// kernel: vae_forward.1
= control target key start
LH: loop header
LB: loop body
LE: loop exit
PB: predicated region body
PF: predicated region fallthrough
CT: control target
= control target key end

     0   :  { %17 = vsyncpa [#allocation3], 0  ;;  %s2665_s0 = inlined_call_operand.vmem [shape: f32[2,1024], index: 0, kind: input, shape index: {}]   ;;  %s2666_s1 = inlined_call_operand.vmem [shape: f32[2,128], index: 1, kind: input, shape index: {}]   ;;  %s2667_s2 = inlined_call_operand.hbm [shape: bf16[1024,128], index: 2, kind: input, shape index: {}]   ;;  %s2668_s3 = inlined_call_operand.vmem [shape: f32[1,128], index: 3, kind: input, shape index: {}]   ;;  %s2669_s4 = inlined_call_operand.hbm [shape: f32[128,256], index: 4, kind: input, shape index: {}]   ;;  %s2670_s5 = inlined_call_operand.vmem [shape: f32[1,256], index: 5, kind: input, shape index: {}]   ;;  %s2671_s6 = inlined_call_operand.vmem [shape: f32[128,128], index: 6, kind: input, shape index: {}]   ;;  %s2672_s7 = inlined_call_operand.vmem [shape: f32[1,128], index: 7, kind: input, shape index: {}]   ;;  %s2673_s8 = inlined_call_operand.hbm [shape: bf16[128,1024], index: 8, kind: input, shape index: {}]   ;;  %s2674_s9 = inlined_call_operand.vmem [shape: f32[1,1024], index: 9, kind: input, shape index: {}]   ;;  %s2675_s10 = inlined_call_operand.vmem [shape: f32[2,1024], index: 10, kind: output, shape index: {0}]   ;;  %s2676_s11 = inlined_call_operand.vmem [shape: f32[2,256], index: 11, kind: output, shape index: {1}]  }
   0x1   :  { %18 = vsyncpa [#allocation5], 0  ;;  %s2399_s17 = smov [#allocation4]   ;;  %s2329_s21 = scalar_lea.hbm %s2669_s4, 4096 }
   0x2   :  { %s42_s18 = sshll.u32 %s2399_s17, 4  ;;  %p2330_p0 = scmp.ne.s32.totalorder %s2669_s4, %s2329_s21  ;;  %s43_s18 = int_to_ptr.vmem [resolvable:$true] %s42_s18 }
   0x3   :  { %p2333_p1 = scmp.lt.u32.totalorder %s2329_s21, %s2669_s4 }
   0x5   :  { %p2335_p2 = pnand %p2333_p1, %p2330_p0 }
   0x7   :  { %2338 = shalt.err (!%p2335_p2)
}
   0x8   :  { %s2339_s26 = scalar_lea.vmem %s43_s18, 4096  ;;  %p2344_p4 = scmp.lt.s32.totalorder %s43_s18, %s43_s18 }
   0x9   :  { %p2340_p3 = scmp.ne.s32.totalorder %s43_s18, %s2339_s26  ;;  %p2345_p5 = scmp.lt.s32.totalorder %s2339_s26, %s2339_s26 }
   0xb   :  { %p2346_p6 = por %p2345_p5, %p2344_p4 }
   0xd   :  { %p2347_p7 = pnand %p2346_p6, %p2340_p3 }
   0xf   :  { %2350 = shalt.err (!%p2347_p7)
}
  0x10   :  { %s2400_s27 = smov 256   ;;  %s2401_s28 = smov 16  }
  0x11   :  { %48 = dma.hbm_to_vmem [thread:$0]  %s2669_s4, 4096, %s43_s18, [#allocation5], %s2400_s27, %s2400_s27, %s2401_s28  }
  0x12   :  { %s2402_s12 = smov [#allocation2]   ;;  %s2351_s16 = scalar_lea.hbm %s2667_s2, 8192 }
  0x13   :  { %s28_s13 = sshll.u32 %s2402_s12, 4  ;;  %p2352_p8 = scmp.ne.s32.totalorder %s2667_s2, %s2351_s16  ;;  %s29_s13 = int_to_ptr.vmem [resolvable:$true] %s28_s13 }
  0x14   :  { %p2355_p9 = scmp.lt.u32.totalorder %s2351_s16, %s2667_s2 }
  0x16   :  { %p2357_p10 = pnand %p2355_p9, %p2352_p8 }
  0x18   :  { %2360 = shalt.err (!%p2357_p10)
}
  0x19   :  { %s2361_s22 = scalar_lea.vmem %s29_s13, 8192  ;;  %p2366_p12 = scmp.lt.s32.totalorder %s29_s13, %s29_s13 }
  0x1a   :  { %p2362_p11 = scmp.ne.s32.totalorder %s29_s13, %s2361_s22  ;;  %p2367_p13 = scmp.lt.s32.totalorder %s2361_s22, %s2361_s22 }
  0x1c   :  { %p2368_p0 = por %p2367_p13, %p2366_p12 }
  0x1e   :  { %p2369_p1 = pnand %p2368_p0, %p2362_p11 }
  0x20   :  { %2372 = shalt.err (!%p2369_p1)
}
  0x21   :  { %s2403_s4 = smov 64   ;;  %s2404_s18 = smov 4  }
  0x22   :  { %34 = dma.hbm_to_vmem [thread:$0]  %s2667_s2, 8192, %s29_s13, [#allocation3], %s2403_s4, %s2403_s4, %s2404_s18  }
  0x23   :  { %s2405_s25 = smov [#allocation6]   ;;  %s2373_s29 = scalar_lea.hbm %s2673_s8, 8192 }
  0x24   :  { %s60_s26 = sshll.u32 %s2405_s25, 4  ;;  %p2374_p2 = scmp.ne.s32.totalorder %s2673_s8, %s2373_s29  ;;  %s61_s26 = int_to_ptr.vmem [resolvable:$true] %s60_s26 }
  0x25   :  { %p2377_p3 = scmp.lt.u32.totalorder %s2373_s29, %s2673_s8 }
  0x27   :  { %p2379_p4 = pnand %p2377_p3, %p2374_p2 }
  0x29   :  { %2382 = shalt.err (!%p2379_p4)
}
  0x2a   :  { %s2383_s16 = scalar_lea.vmem %s61_s26, 8192  ;;  %p2388_p6 = scmp.lt.s32.totalorder %s61_s26, %s61_s26 }
  0x2b   :  { %p2384_p5 = scmp.ne.s32.totalorder %s61_s26, %s2383_s16  ;;  %p2389_p7 = scmp.lt.s32.totalorder %s2383_s16, %s2383_s16 }
  0x2d   :  { %p2390_p8 = por %p2389_p7, %p2388_p6 }
  0x2f   :  { %p2391_p9 = pnand %p2390_p8, %p2384_p5 }
  0x31   :  { %2394 = shalt.err (!%p2391_p9)
}
  0x32   :  { %s2406_s2 = smov 512   ;;  %s2407_s13 = smov 32  }
  0x33   :  { %66 = dma.hbm_to_vmem [thread:$0]  %s2673_s8, 8192, %s61_s26, [#allocation5], %s2406_s2, %s2406_s2, %s2407_s13  }
  0x34   :  { %2395 = dma.done.wait [#allocation3], 8192  }
  0x35   :  { %2396 = vsyncadd [#allocation3], 4294959104 }
  0x36   :  { %2397 = dma.done.wait [#allocation5], 12288  }
  0x37   :  { %2398 = vsyncadd [#allocation5], 4294955008  ;;  %v2235_v0 = vld [vmem:[#allocation2 + $0x40] sm:$0xff]   ;;  %v2239_v4 = vld [vmem:[#allocation2 + $0x48] sm:$0xff]   ;;  %v2408_v24 = vmov 1983009808   ;;  %v102_v26 = vlaneseq }
  0x38   :  { %v2236_v1 = vld [vmem:[#allocation2 + $0xc0] sm:$0xff]   ;;  %2025 = vmatprep.subr.bf16.mxu0 %v2235_v0  ;;  %v2240_v5 = vld [vmem:[#allocation2 + $0xc8] sm:$0xff]   ;;  %v2243_v8 = vld [vmem:[#allocation2 + $0x50] sm:$0xff]   ;;  %v100_v25 = vunpack.c.l.s4 %v2408_v24  ;;  %vm2411_vm0 = vmmov 0  }
  0x39   :  { %v2237_v2 = vld [vmem:[#allocation2] sm:$0xff]   ;;  %2047 = vmatprep.subr.bf16.mxu1 %v2236_v1  ;;  %v2241_v6 = vld [vmem:[#allocation2 + $0x8] sm:$0xff]   ;;  %v2244_v9 = vld [vmem:[#allocation2 + $0xd0] sm:$0xff]   ;;  %v2509_v32 = vshrl.u32 %v102_v26, 7 }
  0x3a   :  { %v2238_v3 = vld [vmem:[#allocation2 + $0x80] sm:$0xff]   ;;  %2026 = vmatpush3.bf16.msra.mxu0 %v2237_v2  ;;  %v2242_v7 = vld [vmem:[#allocation2 + $0x88] sm:$0xff]   ;;  %v2245_v10 = vld [vmem:[#allocation2 + $0x10] sm:$0xff]   ;;  %v101_v31 = vunpack.c.0.s8 %v100_v25 }
  0x3b   :  { %2048 = vmatpush3.bf16.msra.mxu1 %v2238_v3  ;;  %2027 = vmatprep.subr.bf16.mxu0 %v2239_v4  ;;  %v2246_v11 = vld [vmem:[#allocation2 + $0x90] sm:$0xff]   ;;  %v2247_v12 = vld [vmem:[#allocation2 + $0x58] sm:$0xff]   ;;  %v2251_v16 = vld [vmem:[#allocation2 + $0x60] sm:$0xff]  }
  0x3c   :  { %2049 = vmatprep.subr.bf16.mxu1 %v2240_v5  ;;  %v2248_v13 = vld [vmem:[#allocation2 + $0xd8] sm:$0xff]   ;;  %v2252_v17 = vld [vmem:[#allocation2 + $0xe0] sm:$0xff]   ;;  %v2255_v20 = vld [vmem:[#allocation2 + $0x68] sm:$0xff]   ;;  %v2512_v37 = vsub.s32 %v101_v31, %v2509_v32 }
  0x3d   :  { %v2249_v14 = vld [vmem:[#allocation2 + $0x18] sm:$0xff]   ;;  %v2253_v18 = vld [vmem:[#allocation2 + $0x20] sm:$0xff]   ;;  %v2256_v21 = vld [vmem:[#allocation2 + $0xe8] sm:$0xff]  }
  0x3e   :  { %2028 = vmatpush3.bf16.msra.mxu0 %v2241_v6  ;;  %v2250_v15 = vld [vmem:[#allocation2 + $0x98] sm:$0xff]   ;;  %v2254_v19 = vld [vmem:[#allocation2 + $0xa0] sm:$0xff]   ;;  %v2257_v22 = vld [vmem:[#allocation2 + $0x28] sm:$0xff]  }
  0x3f   :  { %2050 = vmatpush3.bf16.msra.mxu1 %v2242_v7  ;;  %2029 = vmatprep.subr.bf16.mxu0 %v2243_v8  ;;  %v2258_v23 = vld [vmem:[#allocation2 + $0xa8] sm:$0xff]   ;;  %v2259_v27 = vld [vmem:[#allocation2 + $0x70] sm:$0xff]   ;;  %v2263_v33 = vld [vmem:[#allocation2 + $0x78] sm:$0xff]  }
  0x40   :  { %2051 = vmatprep.subr.bf16.mxu1 %v2244_v9  ;;  %v2260_v28 = vld [vmem:[#allocation2 + $0xf0] sm:$0xff]   ;;  %v2264_v34 = vld [vmem:[#allocation2 + $0xf8] sm:$0xff]   ;;  %v2273_v44 = vld [vmem:[#allocation2 + $0x140] sm:$0xff]  }
  0x41   :  { %v2261_v29 = vld [vmem:[#allocation2 + $0x30] sm:$0xff]   ;;  %v2265_v35 = vld [vmem:[#allocation2 + $0x38] sm:$0xff]   ;;  %v2274_v47 = vld [vmem:[#allocation2 + $0x1c0] sm:$0xff]  }
  0x42   :  { %2030 = vmatpush3.bf16.msra.mxu0 %v2245_v10  ;;  %v2262_v30 = vld [vmem:[#allocation2 + $0xb0] sm:$0xff]   ;;  %v2266_v36 = vld [vmem:[#allocation2 + $0xb8] sm:$0xff]   ;;  %v2275_v50 = vld [vmem:[#allocation2 + $0x100] sm:$0xff]  }
  0x43   :  { %2052 = vmatpush3.bf16.msra.mxu1 %v2246_v11  ;;  %2031 = vmatprep.subr.bf16.mxu0 %v2247_v12  ;;  %v2267_v38 = vld [vmem:[%s2665_s0] ss:$16 sps:$4 sm:$0xff]   ;;  %v2271_v40 = vld [vmem:[%s2665_s0 + $0x4] ss:$16 sps:$4 sm:$0xff]   ;;  %v2277_v56 = vld [vmem:[#allocation2 + $0x148] sm:$0xff]  }
  0x44   :  { %2053 = vmatprep.subr.bf16.mxu1 %v2248_v13  ;;  %v2269_v39 = vld [vmem:[%s2665_s0 + $0x20] ss:$16 sps:$4 sm:$0xff]   ;;  %v2272_v41 = vld [vmem:[%s2665_s0 + $0x24] ss:$16 sps:$4 sm:$0xff]   ;;  %v105_v42 = vrot.slane %v2267_v38, %v2512_v37  ;;  %v112_v45 = vrot.slane %v2271_v40, %v2512_v37  ;;  %v2278_v59 = vld [vmem:[#allocation2 + $0x1c8] sm:$0xff]  }
  0x45   :  { %v119_v43 = vrot.slane %v2269_v39, %v2512_v37  ;;  %v126_v46 = vrot.slane %v2272_v41, %v2512_v37  ;;  %v2276_v53 = vld [vmem:[#allocation2 + $0x180] sm:$0xff]   ;;  %v2279_v60 = vld [vmem:[#allocation2 + $0x108] sm:$0xff]   ;;  %v2281_v62 = vld [vmem:[#allocation2 + $0x150] sm:$0xff]  }
  0x46   :  { %2032 = vmatpush3.bf16.msra.mxu0 %v2249_v14  ;;  %v2280_v61 = vld [vmem:[#allocation2 + $0x188] sm:$0xff]   ;;  %v2282_v63 = vld [vmem:[#allocation2 + $0x1d0] sm:$0xff]   ;;  %v2285_v2 = vld [vmem:[#allocation2 + $0x158] sm:$0xff]  }
  0x47   :  { %2054 = vmatpush3.bf16.msra.mxu1 %v2250_v15  ;;  %2033 = vmatprep.subr.bf16.mxu0 %v2251_v16  ;;  %v128_v48 = vcombine.high %v105_v42, %v119_v43  ;;  %v127_v49 = vcombine.low %v105_v42, %v119_v43  ;;  %v130_v51 = vcombine.high %v112_v45, %v126_v46  ;;  %v2283_v0 = vld [vmem:[#allocation2 + $0x110] sm:$0xff]   ;;  %v2286_v3 = vld [vmem:[#allocation2 + $0x1d8] sm:$0xff]   ;;  %v2289_v6 = vld [vmem:[#allocation2 + $0x160] sm:$0xff]  }
  0x48   :  { %2055 = vmatprep.subr.bf16.mxu1 %v2252_v17  ;;  %v129_v52 = vcombine.low %v112_v45, %v126_v46  ;;  %v2284_v1 = vld [vmem:[#allocation2 + $0x190] sm:$0xff]   ;;  %v2287_v4 = vld [vmem:[#allocation2 + $0x118] sm:$0xff]   ;;  %v2290_v7 = vld [vmem:[#allocation2 + $0x1e0] sm:$0xff]  }
  0x49   :  { %v176_v54 = vpack.c.bf16 %v128_v48, %v128_v48  ;;  %v175_v55 = vpack.c.bf16 %v127_v49, %v127_v49  ;;  %v178_v57 = vpack.c.bf16 %v130_v51, %v130_v51  ;;  %v2288_v5 = vld [vmem:[#allocation2 + $0x198] sm:$0xff]   ;;  %v2291_v8 = vld [vmem:[#allocation2 + $0x120] sm:$0xff]   ;;  %v2293_v10 = vld [vmem:[#allocation2 + $0x168] sm:$0xff]  }
  0x4a   :  { %2034 = vmatpush3.bf16.msra.mxu0 %v2253_v18  ;;  %v177_v58 = vpack.c.bf16 %v129_v52, %v129_v52  ;;  %v2292_v9 = vld [vmem:[#allocation2 + $0x1a0] sm:$0xff]   ;;  %v2294_v11 = vld [vmem:[#allocation2 + $0x1e8] sm:$0xff]   ;;  %v2297_v14 = vld [vmem:[#allocation2 + $0x170] sm:$0xff]  }
  0x4b   :  { %2056 = vmatpush3.bf16.msra.mxu1 %v2254_v19  ;;  %2035 = vmatprep.subr.bf16.mxu0 %v2255_v20  ;;  %v2295_v12 = vld [vmem:[#allocation2 + $0x128] sm:$0xff]   ;;  %v2298_v15 = vld [vmem:[#allocation2 + $0x1f0] sm:$0xff]   ;;  %v2301_v18 = vld [vmem:[#allocation2 + $0x178] sm:$0xff]  }
  0x4c   :  { %2057 = vmatprep.subr.bf16.mxu1 %v2256_v21  ;;  %734 = vmatprep.mubr.bf16.mxu0 %v176_v54  ;;  %v2296_v13 = vld [vmem:[#allocation2 + $0x1a8] sm:$0xff]   ;;  %v2299_v16 = vld [vmem:[#allocation2 + $0x130] sm:$0xff]   ;;  %v2302_v19 = vld [vmem:[#allocation2 + $0x1f8] sm:$0xff]  }
  0x4d   :  { %774 = vmatprep.mubr.bf16.mxu1 %v178_v57  ;;  %v2300_v17 = vld [vmem:[#allocation2 + $0x1b0] sm:$0xff]   ;;  %v2303_v20 = vld [vmem:[#allocation2 + $0x138] sm:$0xff]   ;;  %v864_v40 = vld [vmem:[#allocation4 + $0x8] sm:$0xff] }
  0x4e   :  { %2036 = vmatpush3.bf16.msra.mxu0 %v2257_v22  ;;  %v2304_v21 = vld [vmem:[#allocation2 + $0x1b8] sm:$0xff]   ;;  %v863_v42 = vld [vmem:[#allocation4] sm:$0xff]  ;;  %v868_v45 = vld [vmem:[#allocation4 + $0x28] sm:$0xff] }
  0x4f   :  { %2058 = vmatpush3.bf16.msra.mxu1 %v2258_v23  ;;  %2037 = vmatprep.subr.bf16.mxu0 %v2259_v27  ;;  %v2305_v22 = vld [vmem:[%s2665_s0 + $0x8] ss:$16 sps:$4 sm:$0xff]   ;;  %v2309_v24 = vld [vmem:[%s2665_s0 + $0xc] ss:$16 sps:$4 sm:$0xff]   ;;  %v867_v49 = vld [vmem:[#allocation4 + $0x20] sm:$0xff] }
  0x50   :  { %2059 = vmatprep.subr.bf16.mxu1 %v2260_v28  ;;  %v2307_v23 = vld [vmem:[%s2665_s0 + $0x28] ss:$16 sps:$4 sm:$0xff]   ;;  %v2310_v25 = vld [vmem:[%s2665_s0 + $0x2c] ss:$16 sps:$4 sm:$0xff]   ;;  %v141_v26 = vrot.slane %v2305_v22, %v2512_v37  ;;  %v148_v28 = vrot.slane %v2309_v24, %v2512_v37  ;;  %v893_v22 = vld [vmem:[#allocation4 + $0xf0] sm:$0xff]  ;;  %v2409_v24 = vmov 0.0  }
  0x51   :  { %v155_v27 = vrot.slane %v2307_v23, %v2512_v37  ;;  %v866_v41 = vld [vmem:[#allocation4 + $0x18] sm:$0xff]  ;;  %v872_v51 = vld [vmem:[#allocation4 + $0x48] sm:$0xff] }
  0x52   :  { %2038 = vmatpush3.bf16.msra.mxu0 %v2261_v29  ;;  %v162_v29 = vrot.slane %v2310_v25, %v2512_v37  ;;  %v2165_v43 = vpack.c.bf16 %v866_v41, %v864_v40  ;;  %v870_v46 = vld [vmem:[#allocation4 + $0x38] sm:$0xff]  ;;  %v876_v57 = vld [vmem:[#allocation4 + $0x68] sm:$0xff]  ;;  %v984_v25 = vld [vmem:[%s2671_s6] sm:$0xff] }
  0x53   :  { %2060 = vmatpush3.bf16.msra.mxu1 %v2262_v30  ;;  %2039 = vmatprep.subr.bf16.mxu0 %v2263_v33  ;;  %v164_v30 = vcombine.high %v141_v26, %v155_v27  ;;  %v163_v31 = vcombine.low %v141_v26, %v155_v27  ;;  %v2169_v48 = vpack.c.bf16 %v870_v46, %v868_v45  ;;  %v874_v52 = vld [vmem:[#allocation4 + $0x58] sm:$0xff]  ;;  %v985_v26 = vld [vmem:[%s2671_s6 + $0x8] sm:$0xff]  ;;  %v986_v27 = vld [vmem:[%s2671_s6 + $0x10] sm:$0xff] }
  0x54   :  { %2061 = vmatprep.subr.bf16.mxu1 %v2264_v34  ;;  %v166_v33 = vcombine.high %v148_v28, %v162_v29  ;;  %v165_v34 = vcombine.low %v148_v28, %v162_v29  ;;  %v2173_v54 = vpack.c.bf16 %v874_v52, %v872_v51  ;;  %v2410_v28 = vmov 0.0|0.0  }
  0x55   :  { %v2198_v29 = vpack.c.bf16 %v985_v26, %v984_v25  ;;  %v1095_v26 = vld [vmem:[#allocation6 + $0x80] sm:$0xff] }
  0x56   :  { %2040 = vmatpush3.bf16.msra.mxu0 %v2265_v35  ;;  %v180_v35 = vpack.c.bf16 %v164_v30, %v164_v30  ;;  %v182_v38 = vpack.c.bf16 %v166_v33, %v166_v33  ;;  %v181_v39 = vpack.c.bf16 %v165_v34, %v165_v34  ;;  %v987_v30 = vld [vmem:[%s2671_s6 + $0x18] sm:$0xff] }
  0x57   :  { %2062 = vmatpush3.bf16.msra.mxu1 %v2266_v36  ;;  %2069 = vmatprep.subr.bf16.mxu0 %v2273_v44  ;;  %v179_v36 = vpack.c.bf16 %v163_v31, %v163_v31  ;;  %v865_v44 = vld [vmem:[#allocation4 + $0x10] sm:$0xff]  ;;  %v2201_v31 = vpack.c.bf16 %v987_v30, %v986_v27  ;;  %v1099_v27 = vld [vmem:[#allocation6 + $0xa0] sm:$0xff] }
  0x58   :  { %2091 = vmatprep.subr.bf16.mxu1 %v2274_v47  ;;  %v2167_v47 = vpack.c.bf16 %v865_v44, %v863_v42  ;;  %v1103_v30 = vld [vmem:[#allocation6 + $0xc0] sm:$0xff] }
  0x59   :  { %735 = vmatmul.mubr.bf16.vlgmr.msra.gmra.mrb[0].mxu0 %v175_v55  ;;  %v871_v55 = vld [vmem:[#allocation4 + $0x40] sm:$0xff] }
  0x5a   :  { %775 = vmatmul.mubr.bf16.vlgmr.msra.gmra.mrb[0].mxu1 %v177_v58  ;;  %2070 = vmatpush3.bf16.msra.mxu0 %v2275_v50  ;;  %v869_v50 = vld [vmem:[#allocation4 + $0x30] sm:$0xff]  ;;  %v878_v58 = vld [vmem:[#allocation4 + $0x78] sm:$0xff] }
  0x5b   :  { %2092 = vmatpush3.bf16.msra.mxu1 %v2276_v53  ;;  %2071 = vmatprep.subr.bf16.mxu0 %v2277_v56  ;;  %v2171_v53 = vpack.c.bf16 %v869_v50, %v867_v49  ;;  %v873_v56 = vld [vmem:[#allocation4 + $0x50] sm:$0xff] }
  0x5c   :  { %2093 = vmatprep.subr.bf16.mxu1 %v2278_v59  ;;  %814 = vmatprep.mubr.bf16.mxu0 %v180_v35  ;;  %v2175_v59 = vpack.c.bf16 %v873_v56, %v871_v55  ;;  %v1893_v35 = vld [vmem:[%s2668_s3] ss:$0 sm:$0xff] }
  0x5d   :  { %854 = vmatprep.mubr.bf16.mxu1 %v182_v38 }
  0x5e   :  { %2072 = vmatpush3.bf16.msra.mxu0 %v2279_v60  ;;  %v2177_v60 = vpack.c.bf16 %v878_v58, %v876_v57 }
  0x5f   :  { %2094 = vmatpush3.bf16.msra.mxu1 %v2280_v61  ;;  %2073 = vmatprep.subr.bf16.mxu0 %v2281_v62  ;;  %v875_v61 = vld [vmem:[#allocation4 + $0x60] sm:$0xff]  ;;  %v877_v62 = vld [vmem:[#allocation4 + $0x70] sm:$0xff] }
  0x60   :  { %2095 = vmatprep.subr.bf16.mxu1 %v2282_v63  ;;  %v880_v63 = vld [vmem:[#allocation4 + $0x88] sm:$0xff] }
  0x62   :  { %2074 = vmatpush3.bf16.msra.mxu0 %v2283_v0  ;;  %v882_v0 = vld [vmem:[#allocation4 + $0x98] sm:$0xff] }
  0x63   :  { %2096 = vmatpush3.bf16.msra.mxu1 %v2284_v1  ;;  %2075 = vmatprep.subr.bf16.mxu0 %v2285_v2  ;;  %v2179_v1 = vpack.c.bf16 %v877_v62, %v875_v61  ;;  %v2181_v2 = vpack.c.bf16 %v882_v0, %v880_v63  ;;  %v989_v61 = vld [vmem:[%s2671_s6 + $0x28] sm:$0xff]  ;;  %v990_v63 = vld [vmem:[%s2671_s6 + $0x30] sm:$0xff]  ;;  %v991_v0 = vld [vmem:[%s2671_s6 + $0x38] sm:$0xff] }
  0x64   :  { %2097 = vmatprep.subr.bf16.mxu1 %v2286_v3  ;;  %v879_v3 = vld [vmem:[#allocation4 + $0x80] sm:$0xff] }
  0x66   :  { %2076 = vmatpush3.bf16.msra.mxu0 %v2287_v4  ;;  %v881_v4 = vld [vmem:[#allocation4 + $0x90] sm:$0xff] }
  0x67   :  { %2098 = vmatpush3.bf16.msra.mxu1 %v2288_v5  ;;  %2077 = vmatprep.subr.bf16.mxu0 %v2289_v6  ;;  %v884_v5 = vld [vmem:[#allocation4 + $0xa8] sm:$0xff]  ;;  %v886_v6 = vld [vmem:[#allocation4 + $0xb8] sm:$0xff] }
  0x68   :  { %2099 = vmatprep.subr.bf16.mxu1 %v2290_v7  ;;  %v2183_v7 = vpack.c.bf16 %v881_v4, %v879_v3  ;;  %v993_v3 = vld [vmem:[%s2671_s6 + $0x48] sm:$0xff] }
  0x6a   :  { %2078 = vmatpush3.bf16.msra.mxu0 %v2291_v8  ;;  %v2185_v8 = vpack.c.bf16 %v886_v6, %v884_v5  ;;  %v994_v5 = vld [vmem:[%s2671_s6 + $0x50] sm:$0xff]  ;;  %v995_v6 = vld [vmem:[%s2671_s6 + $0x58] sm:$0xff] }
  0x6b   :  { %2100 = vmatpush3.bf16.msra.mxu1 %v2292_v9  ;;  %2079 = vmatprep.subr.bf16.mxu0 %v2293_v10  ;;  %v883_v9 = vld [vmem:[#allocation4 + $0xa0] sm:$0xff]  ;;  %v885_v10 = vld [vmem:[#allocation4 + $0xb0] sm:$0xff] }
  0x6c   :  { %2101 = vmatprep.subr.bf16.mxu1 %v2294_v11  ;;  %v2187_v11 = vpack.c.bf16 %v885_v10, %v883_v9  ;;  %v997_v9 = vld [vmem:[%s2671_s6 + $0x68] sm:$0xff]  ;;  %v998_v10 = vld [vmem:[%s2671_s6 + $0x70] sm:$0xff] }
  0x6e   :  { %2080 = vmatpush3.bf16.msra.mxu0 %v2295_v12  ;;  %v888_v12 = vld [vmem:[#allocation4 + $0xc8] sm:$0xff] }
  0x6f   :  { %2102 = vmatpush3.bf16.msra.mxu1 %v2296_v13  ;;  %2081 = vmatprep.subr.bf16.mxu0 %v2297_v14  ;;  %v890_v13 = vld [vmem:[#allocation4 + $0xd8] sm:$0xff] }
  0x70   :  { %2103 = vmatprep.subr.bf16.mxu1 %v2298_v15  ;;  %v2189_v14 = vpack.c.bf16 %v890_v13, %v888_v12  ;;  %v887_v15 = vld [vmem:[#allocation4 + $0xc0] sm:$0xff]  ;;  %v999_v12 = vld [vmem:[%s2671_s6 + $0x78] sm:$0xff] }
  0x71   :  { %v2219_v13 = vpack.c.bf16 %v999_v12, %v998_v10  ;;  %v1112_v12 = vld [vmem:[#allocation6 + $0x108] sm:$0xff] }
  0x72   :  { %2082 = vmatpush3.bf16.msra.mxu0 %v2299_v16  ;;  %v889_v16 = vld [vmem:[#allocation4 + $0xd0] sm:$0xff] }
  0x73   :  { %2104 = vmatpush3.bf16.msra.mxu1 %v2300_v17  ;;  %2083 = vmatprep.subr.bf16.mxu0 %v2301_v18  ;;  %v2191_v17 = vpack.c.bf16 %v889_v16, %v887_v15  ;;  %v892_v18 = vld [vmem:[#allocation4 + $0xe8] sm:$0xff]  ;;  %v1083_v15 = vld [vmem:[#allocation6 + $0x20] sm:$0xff] }
  0x74   :  { %2105 = vmatprep.subr.bf16.mxu1 %v2302_v19  ;;  %v894_v19 = vld [vmem:[#allocation4 + $0xf8] sm:$0xff]  ;;  %v2607_v16 = vld [vmem:[#allocation6 + $0x8] sm:$0xff] }
  0x76   :  { %2084 = vmatpush3.bf16.msra.mxu0 %v2303_v20  ;;  %v2193_v20 = vpack.c.bf16 %v894_v19, %v892_v18  ;;  %v2609_v19 = vld [vmem:[#allocation6 + $0x28] sm:$0xff] }
  0x77   :  { %2106 = vmatpush3.bf16.msra.mxu1 %v2304_v21  ;;  %2166 = vmatprep.subr.bf16.mxu0 %v2165_v43  ;;  %v891_v21 = vld [vmem:[#allocation4 + $0xe0] sm:$0xff] }
  0x78   :  { %v2195_v23 = vpack.c.bf16 %v893_v22, %v891_v21  ;;  %2197 = vmatprep.subr.bf16.mxu1 %v2410_v28  ;;  %v1091_v21 = vld [vmem:[#allocation6 + $0x60] sm:$0xff]  ;;  %v1961_v22 = vcombine.low %v2607_v16, %v2609_v19 }
  0x79   :  { %815 = vmatmul.mubr.bf16.vlgmr.msra.gmra.mrb[4].mxu0 %v179_v36 }
  0x7a   :  { %855 = vmatmul.mubr.bf16.vlgmr.msra.gmra.mrb[4].mxu1 %v181_v39  ;;  %2168 = vmatpush1.bf16.msra.mxu0 %v2167_v47 }
  0x7b   :  { %2170 = vmatprep.subr.bf16.mxu0 %v2169_v48  ;;  %971 = vmatprep.mubr.f32.mxu0 %v2409_v24 }
  0x7c   :  { %2199 = vmatpush3.bf16.msra.mxu1 %v2198_v29  ;;  %2162 = vmatprep.mubr.msk.f32.mxu1 %vm2411_vm0, %v2409_v24  ;;  %v1975_v29 = vcombine.low %v1095_v26, %v1099_v27 }
  0x7d   :  { %2200 = vmatprep.subr.bf16.mxu1 %v2410_v28 }
  0x7e   :  { %2172 = vmatpush1.bf16.msra.mxu0 %v2171_v53 }
  0x7f   :  { %2174 = vmatprep.subr.bf16.mxu0 %v2173_v54 }
  0x80   :  { %2202 = vmatpush3.bf16.msra.mxu1 %v2201_v31  ;;  %v1107_v31 = vld [vmem:[#allocation6 + $0xe0] sm:$0xff] }
  0x81   :  { %2203 = vmatprep.subr.bf16.mxu1 %v2410_v28 }
  0x82   :  { %2176 = vmatpush1.bf16.msra.mxu0 %v2175_v59 }
  0x83   :  { %2178 = vmatprep.subr.bf16.mxu0 %v2177_v60  ;;  %v988_v60 = vld [vmem:[%s2671_s6 + $0x20] sm:$0xff] }
  0x84   :  { %v2204_v62 = vpack.c.bf16 %v989_v61, %v988_v60  ;;  %v981_v61 = vld [vmem:[%s2666_s1] sm:$0xff] }
  0x86   :  { %2180 = vmatpush1.bf16.msra.mxu0 %v2179_v1  ;;  %2205 = vmatpush3.bf16.msra.mxu1 %v2204_v62  ;;  %v2207_v1 = vpack.c.bf16 %v991_v0, %v990_v63  ;;  %v1088_v63 = vld [vmem:[#allocation6 + $0x48] sm:$0xff] }
  0x87   :  { %2182 = vmatprep.subr.bf16.mxu0 %v2181_v2  ;;  %2206 = vmatprep.subr.bf16.mxu1 %v2410_v28  ;;  %v992_v2 = vld [vmem:[%s2671_s6 + $0x40] sm:$0xff]  ;;  %v1092_v0 = vld [vmem:[#allocation6 + $0x68] sm:$0xff] }
  0x88   :  { %v2210_v4 = vpack.c.bf16 %v993_v3, %v992_v2  ;;  %v1970_v3 = vcombine.high %v1088_v63, %v1092_v0 }
  0x8a   :  { %2184 = vmatpush1.bf16.msra.mxu0 %v2183_v7  ;;  %2208 = vmatpush3.bf16.msra.mxu1 %v2207_v1  ;;  %v2213_v7 = vpack.c.bf16 %v995_v6, %v994_v5  ;;  %v1100_v5 = vld [vmem:[#allocation6 + $0xa8] sm:$0xff]  ;;  %v1969_v6 = vcombine.low %v1088_v63, %v1092_v0 }
  0x8b   :  { %2186 = vmatprep.subr.bf16.mxu0 %v2185_v8  ;;  %2209 = vmatprep.subr.bf16.mxu1 %v2410_v28  ;;  %v996_v8 = vld [vmem:[%s2671_s6 + $0x60] sm:$0xff] }
  0x8e   :  { %2188 = vmatpush1.bf16.msra.mxu0 %v2187_v11  ;;  %2211 = vmatpush3.bf16.msra.mxu1 %v2210_v4  ;;  %v2216_v11 = vpack.c.bf16 %v997_v9, %v996_v8  ;;  %v1096_v4 = vld [vmem:[#allocation6 + $0x88] sm:$0xff] }
  0x8f   :  { %2190 = vmatprep.subr.bf16.mxu0 %v2189_v14  ;;  %2212 = vmatprep.subr.bf16.mxu1 %v2410_v28  ;;  %v1079_v14 = vld [vmem:[#allocation6] sm:$0xff]  ;;  %v1104_v8 = vld [vmem:[#allocation6 + $0xc8] sm:$0xff]  ;;  %v1977_v10 = vcombine.low %v1096_v4, %v1100_v5 }
  0x90   :  { %v1960_v18 = vcombine.high %v1079_v14, %v1083_v15  ;;  %v1108_v9 = vld [vmem:[#allocation6 + $0xe8] sm:$0xff] }
  0x92   :  { %2192 = vmatpush1.bf16.msra.mxu0 %v2191_v17  ;;  %2214 = vmatpush3.bf16.msra.mxu1 %v2213_v7  ;;  %v1959_v17 = vcombine.low %v1079_v14, %v1083_v15  ;;  %v1978_v7 = vcombine.high %v1096_v4, %v1100_v5  ;;  %v1985_v14 = vcombine.low %v1104_v8, %v1108_v9  ;;  %v1106_v4 = vld [vmem:[#allocation6 + $0xd8] sm:$0xff] }
  0x93   :  { %2194 = vmatprep.subr.bf16.mxu0 %v2193_v20  ;;  %2215 = vmatprep.subr.bf16.mxu1 %v2410_v28  ;;  %v1087_v20 = vld [vmem:[#allocation6 + $0x40] sm:$0xff]  ;;  %v1110_v5 = vld [vmem:[#allocation6 + $0xf8] sm:$0xff] }
  0x94   :  { %v1968_v24 = vcombine.high %v1087_v20, %v1091_v21  ;;  %v1967_v25 = vcombine.low %v1087_v20, %v1091_v21  ;;  %v1128_v20 = vld [vmem:[#allocation6 + $0x188] sm:$0xff] }
  0x95   :  { %v1132_v21 = vld [vmem:[#allocation6 + $0x1a8] sm:$0xff] }
  0x96   :  { %2196 = vmatpush1.bf16.msra.mxu0 %v2195_v23  ;;  %2217 = vmatpush3.bf16.msra.mxu1 %v2216_v11  ;;  %v1962_v23 = vcombine.high %v2607_v16, %v2609_v19  ;;  %v1986_v11 = vcombine.high %v1104_v8, %v1108_v9  ;;  %v1990_v9 = vcombine.high %v1106_v4, %v1110_v5 }
  0x97   :  { %2218 = vmatprep.subr.bf16.mxu1 %v2410_v28  ;;  %1505 = vmatprep.subr.bf16.mxu0 %v1960_v18  ;;  %v1976_v28 = vcombine.high %v1095_v26, %v1099_v27  ;;  %v1124_v18 = vld [vmem:[#allocation6 + $0x168] sm:$0xff]  ;;  %v1139_v26 = vld [vmem:[#allocation6 + $0x1e0] sm:$0xff] }
  0x98   :  { %v1136_v27 = vld [vmem:[#allocation6 + $0x1c8] sm:$0xff] }
  0x9a   :  { %2220 = vmatpush3.bf16.msra.mxu1 %v2219_v13  ;;  %v1116_v13 = vld [vmem:[#allocation6 + $0x128] sm:$0xff] }
  0x9b   :  { %1546 = vmatprep.subr.bf16.mxu1 %v1962_v23  ;;  %v1994_v15 = vcombine.high %v1112_v12, %v1116_v13  ;;  %v1993_v16 = vcombine.low %v1112_v12, %v1116_v13  ;;  %v2010_v23 = vcombine.high %v1128_v20, %v1132_v21  ;;  %v1114_v12 = vld [vmem:[#allocation6 + $0x118] sm:$0xff] }
  0x9c   :  { %v1118_v13 = vld [vmem:[#allocation6 + $0x138] sm:$0xff] }
 0x12c   :  { %v2041_v33 = vpop.f32.mrb[0].mxu0 }
 0x12d   :  { %v2063_v34 = vpop.f32.mrb[0].mxu1  ;;  %v2042_v36 = vpop.f32.mrb[1].mxu0 }
 0x12e   :  { %v2043_v38 = vadd.f32 %v2042_v36, %v2041_v33  ;;  %v2064_v39 = vpop.f32.mrb[1].mxu1  ;;  %v2044_v40 = vpop.f32.mrb[2].mxu0  ;;  %v1984_v33 = vcombine.high %v1103_v30, %v1107_v31  ;;  %v1115_v36 = vld [vmem:[#allocation6 + $0x120] sm:$0xff] }
 0x12f   :  { %v2065_v41 = vadd.f32 %v2064_v39, %v2063_v34  ;;  %v2066_v42 = vpop.f32.mrb[2].mxu1  ;;  %v2045_v43 = vpop.f32.mrb[3].mxu0  ;;  %v1983_v34 = vcombine.low %v1103_v30, %v1107_v31  ;;  %v1119_v40 = vld [vmem:[#allocation6 + $0x140] sm:$0xff] }
 0x130   :  { %v737_v44 = vadd.f32 %v2043_v38, %v1893_v35  ;;  %v2067_v45 = vpop.f32.mrb[3].mxu1  ;;  %v1111_v35 = vld [vmem:[#allocation6 + $0x100] sm:$0xff] }
 0x131   :  { %v1992_v38 = vcombine.high %v1111_v35, %v1115_v36  ;;  %v1991_v39 = vcombine.low %v1111_v35, %v1115_v36  ;;  %v1131_v45 = vld [vmem:[#allocation6 + $0x1a0] sm:$0xff]  ;;  %v1085_v35 = vld [vmem:[#allocation6 + $0x30] sm:$0xff]  ;;  %v1082_v36 = vld [vmem:[#allocation6 + $0x18] sm:$0xff] }
 0x132   :  { %v777_v46 = vadd.f32 %v2065_v41, %v737_v44  ;;  %v1123_v41 = vld [vmem:[#allocation6 + $0x160] sm:$0xff] }
 0x133   :  { %v2000_v42 = vcombine.high %v1119_v40, %v1123_v41  ;;  %v1999_v43 = vcombine.low %v1119_v40, %v1123_v41  ;;  %v1127_v44 = vld [vmem:[#allocation6 + $0x180] sm:$0xff]  ;;  %v1086_v40 = vld [vmem:[#allocation6 + $0x38] sm:$0xff]  ;;  %v2412_v41 = vmov 0  }
 0x14c   :  { %v2085_v47 = vpop.f32.mrb[4].mxu0 }
 0x14d   :  { %v2107_v48 = vpop.f32.mrb[4].mxu1  ;;  %v2086_v49 = vpop.f32.mrb[5].mxu0 }
 0x14e   :  { %v2087_v50 = vadd.f32 %v2086_v49, %v2085_v47  ;;  %v2108_v51 = vpop.f32.mrb[5].mxu1  ;;  %v2088_v52 = vpop.f32.mrb[6].mxu0  ;;  %v2007_v47 = vcombine.low %v1127_v44, %v1131_v45  ;;  %v895_v49 = vld [vmem:[%s2670_s5] sm:$0x3] }
 0x14f   :  { %v2109_v53 = vadd.f32 %v2108_v51, %v2107_v48  ;;  %v2110_v54 = vpop.f32.mrb[6].mxu1  ;;  %v2089_v55 = vpop.f32.mrb[7].mxu0  ;;  %v899_v48 = vsub.s32 0, %v2509_v32 }
 0x150   :  { %v817_v56 = vadd.f32 %v2087_v50, %v777_v46  ;;  %v2111_v57 = vpop.f32.mrb[7].mxu1  ;;  %v2008_v46 = vcombine.high %v1127_v44, %v1131_v45  ;;  %v903_v50 = vsub.s32 1, %v2509_v32  ;;  %v1958_v44 = vld [vmem:[%s2672_s7] ss:$0 sm:$0xff] }
 0x151   :  { %v900_v51 = vrot.slane %v895_v49, %v899_v48 }
 0x152   :  { %v857_v58 = vadd.f32 %v2109_v53, %v817_v56  ;;  %v904_v52 = vrot.slane %v895_v49, %v903_v50  ;;  %v1089_v49 = vld [vmem:[#allocation6 + $0x50] sm:$0xff] }
 0x154   :  { %v862_v59 = vmax.f32 %v857_v58, 0.0 }
 0x156   :  { %972 = vmatmul.mubr.f32.vlgmr.msra.gmra.mrb[8].mxu0 %v862_v59 }
 0x157   :  { %1506 = vmatpush1.bf16.msra.mxu0 %v1959_v17  ;;  %v1120_v17 = vld [vmem:[#allocation6 + $0x148] sm:$0xff]  ;;  %1537 = vmatprep.mubr.bf16.mxu0 %v2412_v41 }
 0x158   :  { %1507 = vmatprep.subr.bf16.mxu0 %v1968_v24  ;;  %v2002_v19 = vcombine.high %v1120_v17, %v1124_v18  ;;  %v2009_v24 = vcombine.low %v1128_v20, %v1132_v21  ;;  %v1122_v20 = vld [vmem:[#allocation6 + $0x158] sm:$0xff] }
 0x159   :  { %v1126_v21 = vld [vmem:[#allocation6 + $0x178] sm:$0xff] }
 0x15b   :  { %1508 = vmatpush1.bf16.msra.mxu0 %v1967_v25  ;;  %v1135_v25 = vld [vmem:[#allocation6 + $0x1c0] sm:$0xff] }
 0x15c   :  { %1509 = vmatprep.subr.bf16.mxu0 %v1976_v28  ;;  %v2016_v28 = vcombine.high %v1135_v25, %v1139_v26  ;;  %v2015_v30 = vcombine.low %v1135_v25, %v1139_v26  ;;  %v2006_v25 = vcombine.high %v1122_v20, %v1126_v21  ;;  %v1129_v26 = vld [vmem:[#allocation6 + $0x190] sm:$0xff] }
 0x15f   :  { %1510 = vmatpush1.bf16.msra.mxu0 %v1975_v29  ;;  %v1140_v29 = vld [vmem:[#allocation6 + $0x1e8] sm:$0xff] }
 0x160   :  { %1511 = vmatprep.subr.bf16.mxu0 %v1984_v33  ;;  %v2017_v31 = vcombine.low %v1136_v27, %v1140_v29  ;;  %v2018_v33 = vcombine.high %v1136_v27, %v1140_v29  ;;  %v1133_v27 = vld [vmem:[#allocation6 + $0x1b0] sm:$0xff]  ;;  %v1134_v29 = vld [vmem:[#allocation6 + $0x1b8] sm:$0xff] }
 0x163   :  { %1512 = vmatpush1.bf16.msra.mxu0 %v1983_v34  ;;  %v1081_v34 = vld [vmem:[#allocation6 + $0x10] sm:$0xff] }
 0x164   :  { %1513 = vmatprep.subr.bf16.mxu0 %v1992_v38  ;;  %v1963_v38 = vcombine.low %v1081_v34, %v1085_v35 }
 0x167   :  { %1514 = vmatpush1.bf16.msra.mxu0 %v1991_v39  ;;  %v1964_v39 = vcombine.high %v1081_v34, %v1085_v35  ;;  %v1137_v35 = vld [vmem:[#allocation6 + $0x1d0] sm:$0xff] }
 0x168   :  { %1515 = vmatprep.subr.bf16.mxu0 %v2000_v42  ;;  %v1965_v42 = vcombine.low %v1082_v36, %v1086_v40 }
 0x16b   :  { %1516 = vmatpush1.bf16.msra.mxu0 %v1999_v43  ;;  %v1966_v43 = vcombine.high %v1082_v36, %v1086_v40  ;;  %v1141_v36 = vld [vmem:[#allocation6 + $0x1f0] sm:$0xff]  ;;  %v2011_v40 = vcombine.low %v1129_v26, %v1133_v27 }
 0x16c   :  { %1517 = vmatprep.subr.bf16.mxu0 %v2008_v46 }
 0x16f   :  { %1518 = vmatpush1.bf16.msra.mxu0 %v2007_v47 }
 0x170   :  { %1519 = vmatprep.subr.bf16.mxu0 %v2016_v28  ;;  %v1130_v28 = vld [vmem:[#allocation6 + $0x198] sm:$0xff] }
 0x171   :  { %v2014_v34 = vcombine.high %v1130_v28, %v1134_v29 }
 0x173   :  { %1520 = vmatpush1.bf16.msra.mxu0 %v2015_v30 }
 0x174   :  { %1587 = vmatprep.subr.bf16.mxu0 %v1964_v39  ;;  %v1142_v39 = vld [vmem:[#allocation6 + $0x1f8] sm:$0xff] }
 0x229   :  { %v973_v53 = vpop.f32.mrb[8].mxu0 }
 0x22a   :  { %v974_v54 = vadd.f32 %v973_v53, %v900_v51  ;;  %v975_v55 = vpop.f32.mrb[9].mxu0  ;;  %v1093_v51 = vld [vmem:[#allocation6 + $0x70] sm:$0xff]  ;;  %v1094_v53 = vld [vmem:[#allocation6 + $0x78] sm:$0xff] }
 0x22b   :  { %v976_v56 = vadd.f32 %v975_v55, %v904_v52  ;;  %v1090_v52 = vld [vmem:[#allocation6 + $0x58] sm:$0xff] }
 0x22c   :  { %v1973_v63 = vcombine.low %v1090_v52, %v1094_v53 }
 0x22d   :  { %v978_v57 = vmul.f32 0.5, %v976_v56  ;;  %v1799_v58 = vcombine.low %v974_v54, %v976_v56  ;;  %v1972_v56 = vcombine.high %v1089_v49, %v1093_v51 }
 0x22f   :  { %v979_v59 = vmul.f32 1.442695, %v978_v57  ;;  %2023 = vst.sshfl [vmem:[#allocation8] sm:$0x33 pattern:$0x76325410] %v1799_v58  ;;  %v1974_v57 = vcombine.high %v1090_v52, %v1094_v53 }
 0x230   :  { %v1097_v58 = vld [vmem:[#allocation6 + $0x90] sm:$0xff] }
 0x231   :  { %2311 = vpow2.f32 %v979_v59  ;;  %v1101_v59 = vld [vmem:[#allocation6 + $0xb0] sm:$0xff] }
 0x232   :  { %v1980_v0 = vcombine.high %v1097_v58, %v1101_v59 }
 0x236   :  { %v1863_v60 = vld [vmem:[#allocation8] sm:$0xf] }
 0x237   :  { %1864 = vst [vmem:[%s2676_s11] sm:$0xf] %v1863_v60  ;;  %v1098_v60 = vld [vmem:[#allocation6 + $0x98] sm:$0xff] }
 0x23b   :  { %v2312_v62 = vpop.eup %2311 }
 0x23c   :  { %v982_v1 = vmul.f32 %v2312_v62, %v981_v61  ;;  %v1102_v61 = vld [vmem:[#allocation6 + $0xb8] sm:$0xff]  ;;  %v1971_v62 = vcombine.low %v1089_v49, %v1093_v51  ;;  %v1159_v49 = vsub.s32 3, %v2509_v32 }
 0x23e   :  { %v983_v2 = vadd.f32 %v982_v1, %v974_v54  ;;  %v1982_v1 = vcombine.high %v1098_v60, %v1102_v61 }
 0x240   :  { %2163 = vmatmul.mubr.f32.vlgmr.msra.gmra.mrb[8].mxu1 %v983_v2  ;;  %v1105_v2 = vld [vmem:[#allocation6 + $0xd0] sm:$0xff] }
 0x241   :  { %1547 = vmatpush1.bf16.msra.mxu1 %v1961_v22  ;;  %v2001_v22 = vcombine.low %v1120_v17, %v1124_v18  ;;  %1578 = vmatprep.mubr.bf16.mxu1 %v2412_v41  ;;  %v1998_v18 = vcombine.high %v1114_v12, %v1118_v13 }
 0x242   :  { %1548 = vmatprep.subr.bf16.mxu1 %v1970_v3  ;;  %v1109_v3 = vld [vmem:[#allocation6 + $0xf0] sm:$0xff] }
 0x243   :  { %v1988_v8 = vcombine.high %v1105_v2, %v1109_v3 }
 0x245   :  { %1549 = vmatpush1.bf16.msra.mxu1 %v1969_v6  ;;  %v1979_v6 = vcombine.low %v1097_v58, %v1101_v59 }
 0x246   :  { %1550 = vmatprep.subr.bf16.mxu1 %v1978_v7  ;;  %v1981_v7 = vcombine.low %v1098_v60, %v1102_v61 }
 0x249   :  { %1551 = vmatpush1.bf16.msra.mxu1 %v1977_v10  ;;  %v1113_v10 = vld [vmem:[#allocation6 + $0x110] sm:$0xff] }
 0x24a   :  { %1552 = vmatprep.subr.bf16.mxu1 %v1986_v11  ;;  %v1117_v11 = vld [vmem:[#allocation6 + $0x130] sm:$0xff] }
 0x24b   :  { %v1996_v17 = vcombine.high %v1113_v10, %v1117_v11 }
 0x24d   :  { %1553 = vmatpush1.bf16.msra.mxu1 %v1985_v14  ;;  %v1987_v14 = vcombine.low %v1105_v2, %v1109_v3 }
 0x24e   :  { %1554 = vmatprep.subr.bf16.mxu1 %v1994_v15  ;;  %v1989_v15 = vcombine.low %v1106_v4, %v1110_v5 }
 0x251   :  { %1555 = vmatpush1.bf16.msra.mxu1 %v1993_v16  ;;  %v1121_v16 = vld [vmem:[#allocation6 + $0x150] sm:$0xff] }
 0x252   :  { %1556 = vmatprep.subr.bf16.mxu1 %v2002_v19  ;;  %v1125_v19 = vld [vmem:[#allocation6 + $0x170] sm:$0xff] }
 0x253   :  { %v2003_v30 = vcombine.low %v1121_v16, %v1125_v19 }
 0x255   :  { %1557 = vmatpush1.bf16.msra.mxu1 %v2001_v22  ;;  %v1995_v22 = vcombine.low %v1113_v10, %v1117_v11 }
 0x256   :  { %1558 = vmatprep.subr.bf16.mxu1 %v2010_v23  ;;  %v1997_v23 = vcombine.low %v1114_v12, %v1118_v13 }
 0x259   :  { %1559 = vmatpush1.bf16.msra.mxu1 %v2009_v24  ;;  %v2004_v24 = vcombine.high %v1121_v16, %v1125_v19 }
 0x25a   :  { %1560 = vmatprep.subr.bf16.mxu1 %v2018_v33  ;;  %v2012_v33 = vcombine.high %v1129_v26, %v1133_v27 }
 0x25d   :  { %1561 = vmatpush1.bf16.msra.mxu1 %v2017_v31  ;;  %v2005_v31 = vcombine.low %v1122_v20, %v1126_v21  ;;  %v1163_v21 = vsub.s32 4, %v2509_v32 }
 0x25e   :  { %1628 = vmatprep.subr.bf16.mxu1 %v1966_v43 }
 0x313   :  { %v1073_v45 = vpop.f32.mrb[8].mxu1 }
 0x314   :  { %v1074_v46 = vadd.f32 %v1958_v44, %v1073_v45  ;;  %v2164_v47 = vpop.f32.mrb[9].mxu1  ;;  %v2019_v44 = vcombine.low %v1137_v35, %v1141_v36 }
 0x315   :  { %v1143_v47 = vld [vmem:[%s2674_s9] sm:$0xff] }
 0x316   :  { %v1077_v54 = vmax.f32 %v1074_v46, 0.0  ;;  %v1155_v46 = vsub.s32 2, %v2509_v32  ;;  %v1148_v51 = vrot.slane %v1143_v47, %v899_v48  ;;  %v1152_v53 = vrot.slane %v1143_v47, %v903_v50 }
 0x317   :  { %v1164_v26 = vrot.slane %v1143_v47, %v1163_v21 }
 0x318   :  { %v2636_v55 = vpack.c.bf16 %v1077_v54, %v1077_v54  ;;  %v1156_v52 = vrot.slane %v1143_v47, %v1155_v46  ;;  %v1160_v54 = vrot.slane %v1143_v47, %v1159_v49 }
 0x31a   :  { %1538 = vmatmul.mubr.bf16.vlgmr.msra.gmra.mrb[12].mxu0 %v2636_v55  ;;  %1579 = vmatmul.mubr.bf16.vlgmr.msra.gmra.mrb[12].mxu1 %v2636_v55 }
 0x31b   :  { %1588 = vmatpush1.bf16.msra.mxu0 %v1963_v38  ;;  %1629 = vmatpush1.bf16.msra.mxu1 %v1965_v42  ;;  %v1138_v38 = vld [vmem:[#allocation6 + $0x1d8] sm:$0xff]  ;;  %v2020_v42 = vcombine.high %v1137_v35, %v1141_v36 }
 0x31c   :  { %1589 = vmatprep.subr.bf16.mxu0 %v1972_v56  ;;  %1630 = vmatprep.subr.bf16.mxu1 %v1974_v57  ;;  %v2022_v43 = vcombine.high %v1138_v38, %v1142_v39  ;;  %v2021_v45 = vcombine.low %v1138_v38, %v1142_v39 }
 0x31d   :  { %1619 = vmatprep.mubr.bf16.mxu0 %v2412_v41  ;;  %1660 = vmatprep.mubr.bf16.mxu1 %v2412_v41  ;;  %v2013_v41 = vcombine.low %v1130_v28, %v1134_v29 }
 0x31f   :  { %1590 = vmatpush1.bf16.msra.mxu0 %v1971_v62  ;;  %1631 = vmatpush1.bf16.msra.mxu1 %v1973_v63 }
 0x320   :  { %1591 = vmatprep.subr.bf16.mxu0 %v1980_v0  ;;  %1632 = vmatprep.subr.bf16.mxu1 %v1982_v1 }
 0x323   :  { %1592 = vmatpush1.bf16.msra.mxu0 %v1979_v6  ;;  %1633 = vmatpush1.bf16.msra.mxu1 %v1981_v7 }
 0x324   :  { %1593 = vmatprep.subr.bf16.mxu0 %v1988_v8  ;;  %1634 = vmatprep.subr.bf16.mxu1 %v1990_v9 }
 0x327   :  { %1594 = vmatpush1.bf16.msra.mxu0 %v1987_v14  ;;  %1635 = vmatpush1.bf16.msra.mxu1 %v1989_v15 }
 0x328   :  { %1595 = vmatprep.subr.bf16.mxu0 %v1996_v17  ;;  %1636 = vmatprep.subr.bf16.mxu1 %v1998_v18 }
 0x32b   :  { %1596 = vmatpush1.bf16.msra.mxu0 %v1995_v22  ;;  %1637 = vmatpush1.bf16.msra.mxu1 %v1997_v23  ;;  %v1171_v22 = vsub.s32 6, %v2509_v32  ;;  %v1167_v23 = vsub.s32 5, %v2509_v32 }
 0x32c   :  { %1597 = vmatprep.subr.bf16.mxu0 %v2004_v24  ;;  %1638 = vmatprep.subr.bf16.mxu1 %v2006_v25  ;;  %v1175_v24 = vsub.s32 7, %v2509_v32 }
 0x32d   :  { %v1172_v27 = vrot.slane %v1143_v47, %v1171_v22  ;;  %v1168_v28 = vrot.slane %v1143_v47, %v1167_v23 }
 0x32e   :  { %v1176_v29 = vrot.slane %v1143_v47, %v1175_v24 }
 0x32f   :  { %1598 = vmatpush1.bf16.msra.mxu0 %v2003_v30  ;;  %1639 = vmatpush1.bf16.msra.mxu1 %v2005_v31 }
 0x330   :  { %1599 = vmatprep.subr.bf16.mxu0 %v2012_v33  ;;  %1640 = vmatprep.subr.bf16.mxu1 %v2014_v34 }
 0x333   :  { %1600 = vmatpush1.bf16.msra.mxu0 %v2011_v40  ;;  %1641 = vmatpush1.bf16.msra.mxu1 %v2013_v41 }
 0x334   :  { %1601 = vmatprep.subr.bf16.mxu0 %v2020_v42  ;;  %1642 = vmatprep.subr.bf16.mxu1 %v2022_v43 }
 0x337   :  { %1602 = vmatpush1.bf16.msra.mxu0 %v2019_v44  ;;  %1643 = vmatpush1.bf16.msra.mxu1 %v2021_v45 }
 0x33a   :  { %1620 = vmatmul.mubr.bf16.vlgmr.msra.gmra.mrb[16].mxu0 %v2636_v55  ;;  %1661 = vmatmul.mubr.bf16.vlgmr.msra.gmra.mrb[16].mxu1 %v2636_v55 }
 0x3ed   :  { %v1539_v56 = vpop.f32.mrb[12].mxu0  ;;  %v1580_v57 = vpop.f32.mrb[12].mxu1 }
 0x3ee   :  { %v1540_v58 = vadd.f32 %v1539_v56, %v1148_v51  ;;  %v1581_v55 = vadd.f32 %v1580_v57, %v1156_v52  ;;  %v1541_v59 = vpop.f32.mrb[13].mxu0  ;;  %v1582_v60 = vpop.f32.mrb[13].mxu1 }
 0x3ef   :  { %v1542_v61 = vadd.f32 %v1541_v59, %v1152_v53  ;;  %v1583_v62 = vadd.f32 %v1582_v60, %v1160_v54  ;;  %v1543_v63 = vpop.f32.mrb[14].mxu0  ;;  %v1584_v0 = vpop.f32.mrb[14].mxu1 }
 0x3f0   :  { %v1669_v1 = vmul.f32 0.5, %v1540_v58  ;;  %v1671_v2 = vmul.f32 0.5, %v1581_v55  ;;  %v1544_v3 = vpop.f32.mrb[15].mxu0  ;;  %v1585_v4 = vpop.f32.mrb[15].mxu1 }
 0x3f1   :  { %v1670_v48 = vmul.f32 0.5, %v1542_v61  ;;  %v1672_v5 = vmul.f32 0.5, %v1583_v62 }
 0x3f2   :  { %2313 = vtanh.f32 %v1669_v1 }
 0x3f3   :  { %2315 = vtanh.f32 %v1671_v2 }
 0x3f4   :  { %2317 = vtanh.f32 %v1670_v48 }
 0x3f5   :  { %2319 = vtanh.f32 %v1672_v5 }
 0x3fc   :  { %v2314_v50 = vpop.eup %2313 }
 0x3fd   :  { %v2316_v6 = vpop.eup %2315  ;;  %v1685_v7 = vmul.f32 0.5, %v2314_v50 }
 0x3fe   :  { %v2318_v8 = vpop.eup %2317  ;;  %v1687_v9 = vmul.f32 0.5, %v2316_v6 }
 0x3ff   :  { %v2320_v10 = vpop.eup %2319  ;;  %v1693_v11 = vadd.f32 0.5, %v1685_v7  ;;  %v1686_v12 = vmul.f32 0.5, %v2318_v8 }
 0x400   :  { %v1695_v13 = vadd.f32 0.5, %v1687_v9  ;;  %v1688_v14 = vmul.f32 0.5, %v2320_v10 }
 0x401   :  { %v1694_v15 = vadd.f32 0.5, %v1686_v12 }
 0x402   :  { %v1696_v17 = vadd.f32 0.5, %v1688_v14 }
 0x403   :  { %v1709_v18 = vcombine.low %v1693_v11, %v1694_v15 }
 0x404   :  { %v1711_v16 = vcombine.low %v1695_v13, %v1696_v17 }
 0x405   :  { %v1719_v19 = vrot.slane %v1709_v18, %v2512_v37 }
 0x406   :  { %v1733_v20 = vrot.slane %v1711_v16, %v2512_v37 }
 0x408   :  { %v1741_v25 = vcombine.low %v1719_v19, %v1733_v20 }
 0x40a   :  { %1840 = vst [vmem:[%s2675_s10] sm:$0xff] %v1741_v25 }
 0x40d   :  { %v1621_v30 = vpop.f32.mrb[16].mxu0  ;;  %v1662_v31 = vpop.f32.mrb[16].mxu1 }
 0x40e   :  { %v1622_v33 = vadd.f32 %v1621_v30, %v1164_v26  ;;  %v1663_v34 = vadd.f32 %v1662_v31, %v1172_v27  ;;  %v1623_v35 = vpop.f32.mrb[17].mxu0  ;;  %v1664_v36 = vpop.f32.mrb[17].mxu1 }
 0x40f   :  { %v1624_v38 = vadd.f32 %v1623_v35, %v1168_v28  ;;  %v1665_v39 = vadd.f32 %v1664_v36, %v1176_v29  ;;  %v1625_v40 = vpop.f32.mrb[18].mxu0  ;;  %v1666_v41 = vpop.f32.mrb[18].mxu1 }
 0x410   :  { %v1673_v32 = vmul.f32 0.5, %v1622_v33  ;;  %v1675_v42 = vmul.f32 0.5, %v1663_v34  ;;  %v1626_v43 = vpop.f32.mrb[19].mxu0  ;;  %v1667_v44 = vpop.f32.mrb[19].mxu1 }
 0x411   :  { %v1674_v45 = vmul.f32 0.5, %v1624_v38  ;;  %v1676_v46 = vmul.f32 0.5, %v1665_v39 }
 0x412   :  { %2321 = vtanh.f32 %v1673_v32 }
 0x413   :  { %2323 = vtanh.f32 %v1675_v42 }
 0x414   :  { %2325 = vtanh.f32 %v1674_v45 }
 0x415   :  { %2327 = vtanh.f32 %v1676_v46 }
 0x41c   :  { %v2322_v47 = vpop.eup %2321 }
 0x41d   :  { %v2324_v49 = vpop.eup %2323  ;;  %v1689_v51 = vmul.f32 0.5, %v2322_v47 }
 0x41e   :  { %v2326_v52 = vpop.eup %2325  ;;  %v1691_v53 = vmul.f32 0.5, %v2324_v49 }
 0x41f   :  { %v2328_v54 = vpop.eup %2327  ;;  %v1697_v56 = vadd.f32 0.5, %v1689_v51  ;;  %v1690_v57 = vmul.f32 0.5, %v2326_v52 }
 0x420   :  { %v1699_v58 = vadd.f32 0.5, %v1691_v53  ;;  %v1692_v55 = vmul.f32 0.5, %v2328_v54 }
 0x421   :  { %v1698_v59 = vadd.f32 0.5, %v1690_v57 }
 0x422   :  { %v1700_v60 = vadd.f32 0.5, %v1692_v55 }
 0x423   :  { %v1745_v61 = vcombine.low %v1697_v56, %v1698_v59 }
 0x424   :  { %v1747_v62 = vcombine.low %v1699_v58, %v1700_v60 }
 0x425   :  { %v1755_v63 = vrot.slane %v1745_v61, %v2512_v37 }
 0x426   :  { %v1769_v0 = vrot.slane %v1747_v62, %v2512_v37 }
 0x428   :  { %v1777_v1 = vcombine.low %v1755_v63, %v1769_v0 }
 0x42a   :  { %1842 = vst [vmem:[%s2675_s10 + $0x8] sm:$0xff] %v1777_v1 }
 0x42b   :  { %1883 = vsyncpa [#allocation3], 1 }
 0x42c   :  { %1884 = vsyncpa [#allocation5], 1 }

// kernel: vae_forward.1
= control target key start
LH: loop header
LB: loop body
LE: loop exit
PB: predicated region body
PF: predicated region fallthrough
CT: control target
= control target key end

     0   :  { %17 = vsyncpa [#allocation3], 0  ;;  %s2665_s0 = inlined_call_operand.vmem [shape: f32[2,1024], index: 0, kind: input, shape index: {}]   ;;  %s2666_s1 = inlined_call_operand.vmem [shape: f32[2,128], index: 1, kind: input, shape index: {}]   ;;  %s2667_s2 = inlined_call_operand.hbm [shape: bf16[1024,128], index: 2, kind: input, shape index: {}]   ;;  %s2668_s3 = inlined_call_operand.vmem [shape: f32[1,128], index: 3, kind: input, shape index: {}]   ;;  %s2669_s4 = inlined_call_operand.hbm [shape: f32[128,256], index: 4, kind: input, shape index: {}]   ;;  %s2670_s5 = inlined_call_operand.vmem [shape: f32[1,256], index: 5, kind: input, shape index: {}]   ;;  %s2671_s6 = inlined_call_operand.vmem [shape: f32[128,128], index: 6, kind: input, shape index: {}]   ;;  %s2672_s7 = inlined_call_operand.vmem [shape: f32[1,128], index: 7, kind: input, shape index: {}]   ;;  %s2673_s8 = inlined_call_operand.hbm [shape: bf16[128,1024], index: 8, kind: input, shape index: {}]   ;;  %s2674_s9 = inlined_call_operand.vmem [shape: f32[1,1024], index: 9, kind: input, shape index: {}]   ;;  %s2675_s10 = inlined_call_operand.vmem [shape: f32[2,1024], index: 10, kind: output, shape index: {0}]   ;;  %s2676_s11 = inlined_call_operand.vmem [shape: f32[2,256], index: 11, kind: output, shape index: {1}]  }
   0x1   :  { %18 = vsyncpa [#allocation5], 0  ;;  %s2399_s17 = smov [#allocation4]   ;;  %s2329_s21 = scalar_lea.hbm %s2669_s4, 4096 }
   0x2   :  { %s42_s18 = sshll.u32 %s2399_s17, 4  ;;  %p2330_p0 = scmp.ne.s32.totalorder %s2669_s4, %s2329_s21  ;;  %s43_s18 = int_to_ptr.vmem [resolvable:$true] %s42_s18 }
   0x3   :  { %p2333_p1 = scmp.lt.u32.totalorder %s2329_s21, %s2669_s4 }
   0x5   :  { %p2335_p2 = pnand %p2333_p1, %p2330_p0 }
   0x7   :  { %2338 = shalt.err (!%p2335_p2)
}
   0x8   :  { %s2339_s26 = scalar_lea.vmem %s43_s18, 4096  ;;  %p2344_p4 = scmp.lt.s32.totalorder %s43_s18, %s43_s18 }
   0x9   :  { %p2340_p3 = scmp.ne.s32.totalorder %s43_s18, %s2339_s26  ;;  %p2345_p5 = scmp.lt.s32.totalorder %s2339_s26, %s2339_s26 }
   0xb   :  { %p2346_p6 = por %p2345_p5, %p2344_p4 }
   0xd   :  { %p2347_p7 = pnand %p2346_p6, %p2340_p3 }
   0xf   :  { %2350 = shalt.err (!%p2347_p7)
}
  0x10   :  { %s2400_s27 = smov 256   ;;  %s2401_s28 = smov 16  }
  0x11   :  { %48 = dma.hbm_to_vmem [thread:$0]  %s2669_s4, 4096, %s43_s18, [#allocation5], %s2400_s27, %s2400_s27, %s2401_s28  }
  0x12   :  { %s2402_s12 = smov [#allocation2]   ;;  %s2351_s16 = scalar_lea.hbm %s2667_s2, 8192 }
  0x13   :  { %s28_s13 = sshll.u32 %s2402_s12, 4  ;;  %p2352_p8 = scmp.ne.s32.totalorder %s2667_s2, %s2351_s16  ;;  %s29_s13 = int_to_ptr.vmem [resolvable:$true] %s28_s13 }
  0x14   :  { %p2355_p9 = scmp.lt.u32.totalorder %s2351_s16, %s2667_s2 }
  0x16   :  { %p2357_p10 = pnand %p2355_p9, %p2352_p8 }
  0x18   :  { %2360 = shalt.err (!%p2357_p10)
}
  0x19   :  { %s2361_s22 = scalar_lea.vmem %s29_s13, 8192  ;;  %p2366_p12 = scmp.lt.s32.totalorder %s29_s13, %s29_s13 }
  0x1a   :  { %p2362_p11 = scmp.ne.s32.totalorder %s29_s13, %s2361_s22  ;;  %p2367_p13 = scmp.lt.s32.totalorder %s2361_s22, %s2361_s22 }
  0x1c   :  { %p2368_p0 = por %p2367_p13, %p2366_p12 }
  0x1e   :  { %p2369_p1 = pnand %p2368_p0, %p2362_p11 }
  0x20   :  { %2372 = shalt.err (!%p2369_p1)
}
  0x21   :  { %s2403_s4 = smov 64   ;;  %s2404_s18 = smov 4  }
  0x22   :  { %34 = dma.hbm_to_vmem [thread:$0]  %s2667_s2, 8192, %s29_s13, [#allocation3], %s2403_s4, %s2403_s4, %s2404_s18  }
  0x23   :  { %s2405_s25 = smov [#allocation6]   ;;  %s2373_s29 = scalar_lea.hbm %s2673_s8, 8192 }
  0x24   :  { %s60_s26 = sshll.u32 %s2405_s25, 4  ;;  %p2374_p2 = scmp.ne.s32.totalorder %s2673_s8, %s2373_s29  ;;  %s61_s26 = int_to_ptr.vmem [resolvable:$true] %s60_s26 }
  0x25   :  { %p2377_p3 = scmp.lt.u32.totalorder %s2373_s29, %s2673_s8 }
  0x27   :  { %p2379_p4 = pnand %p2377_p3, %p2374_p2 }
  0x29   :  { %2382 = shalt.err (!%p2379_p4)
}
  0x2a   :  { %s2383_s16 = scalar_lea.vmem %s61_s26, 8192  ;;  %p2388_p6 = scmp.lt.s32.totalorder %s61_s26, %s61_s26 }
  0x2b   :  { %p2384_p5 = scmp.ne.s32.totalorder %s61_s26, %s2383_s16  ;;  %p2389_p7 = scmp.lt.s32.totalorder %s2383_s16, %s2383_s16 }
  0x2d   :  { %p2390_p8 = por %p2389_p7, %p2388_p6 }
  0x2f   :  { %p2391_p9 = pnand %p2390_p8, %p2384_p5 }
  0x31   :  { %2394 = shalt.err (!%p2391_p9)
}
  0x32   :  { %s2406_s2 = smov 512   ;;  %s2407_s13 = smov 32  }
  0x33   :  { %66 = dma.hbm_to_vmem [thread:$0]  %s2673_s8, 8192, %s61_s26, [#allocation5], %s2406_s2, %s2406_s2, %s2407_s13  }
  0x34   :  { %2395 = dma.done.wait [#allocation3], 8192  }
  0x35   :  { %2396 = vsyncadd [#allocation3], 4294959104 }
  0x36   :  { %2397 = dma.done.wait [#allocation5], 12288  }
  0x37   :  { %2398 = vsyncadd [#allocation5], 4294955008  ;;  %v2235_v0 = vld [vmem:[#allocation2 + $0x40] sm:$0xff]   ;;  %v2239_v4 = vld [vmem:[#allocation2 + $0x48] sm:$0xff]   ;;  %v2408_v24 = vmov 1983009808   ;;  %v102_v26 = vlaneseq }
  0x38   :  { %v2236_v1 = vld [vmem:[#allocation2 + $0xc0] sm:$0xff]   ;;  %2025 = vmatprep.subr.bf16.mxu0 %v2235_v0  ;;  %v2240_v5 = vld [vmem:[#allocation2 + $0xc8] sm:$0xff]   ;;  %v2243_v8 = vld [vmem:[#allocation2 + $0x50] sm:$0xff]   ;;  %v100_v25 = vunpack.c.l.s4 %v2408_v24  ;;  %vm2411_vm0 = vmmov 0  }
  0x39   :  { %v2237_v2 = vld [vmem:[#allocation2] sm:$0xff]   ;;  %2047 = vmatprep.subr.bf16.mxu1 %v2236_v1  ;;  %v2241_v6 = vld [vmem:[#allocation2 + $0x8] sm:$0xff]   ;;  %v2244_v9 = vld [vmem:[#allocation2 + $0xd0] sm:$0xff]   ;;  %v2509_v32 = vshrl.u32 %v102_v26, 7 }
  0x3a   :  { %v2238_v3 = vld [vmem:[#allocation2 + $0x80] sm:$0xff]   ;;  %2026 = vmatpush3.bf16.msra.mxu0 %v2237_v2  ;;  %v2242_v7 = vld [vmem:[#allocation2 + $0x88] sm:$0xff]   ;;  %v2245_v10 = vld [vmem:[#allocation2 + $0x10] sm:$0xff]   ;;  %v101_v31 = vunpack.c.0.s8 %v100_v25 }
  0x3b   :  { %2048 = vmatpush3.bf16.msra.mxu1 %v2238_v3  ;;  %2027 = vmatprep.subr.bf16.mxu0 %v2239_v4  ;;  %v2246_v11 = vld [vmem:[#allocation2 + $0x90] sm:$0xff]   ;;  %v2247_v12 = vld [vmem:[#allocation2 + $0x58] sm:$0xff]   ;;  %v2251_v16 = vld [vmem:[#allocation2 + $0x60] sm:$0xff]  }
  0x3c   :  { %2049 = vmatprep.subr.bf16.mxu1 %v2240_v5  ;;  %v2248_v13 = vld [vmem:[#allocation2 + $0xd8] sm:$0xff]   ;;  %v2252_v17 = vld [vmem:[#allocation2 + $0xe0] sm:$0xff]   ;;  %v2255_v20 = vld [vmem:[#allocation2 + $0x68] sm:$0xff]   ;;  %v2512_v37 = vsub.s32 %v101_v31, %v2509_v32 }
  0x3d   :  { %v2249_v14 = vld [vmem:[#allocation2 + $0x18] sm:$0xff]   ;;  %v2253_v18 = vld [vmem:[#allocation2 + $0x20] sm:$0xff]   ;;  %v2256_v21 = vld [vmem:[#allocation2 + $0xe8] sm:$0xff]  }
  0x3e   :  { %2028 = vmatpush3.bf16.msra.mxu0 %v2241_v6  ;;  %v2250_v15 = vld [vmem:[#allocation2 + $0x98] sm:$0xff]   ;;  %v2254_v19 = vld [vmem:[#allocation2 + $0xa0] sm:$0xff]   ;;  %v2257_v22 = vld [vmem:[#allocation2 + $0x28] sm:$0xff]  }
  0x3f   :  { %2050 = vmatpush3.bf16.msra.mxu1 %v2242_v7  ;;  %2029 = vmatprep.subr.bf16.mxu0 %v2243_v8  ;;  %v2258_v23 = vld [vmem:[#allocation2 + $0xa8] sm:$0xff]   ;;  %v2259_v27 = vld [vmem:[#allocation2 + $0x70] sm:$0xff]   ;;  %v2263_v33 = vld [vmem:[#allocation2 + $0x78] sm:$0xff]  }
  0x40   :  { %2051 = vmatprep.subr.bf16.mxu1 %v2244_v9  ;;  %v2260_v28 = vld [vmem:[#allocation2 + $0xf0] sm:$0xff]   ;;  %v2264_v34 = vld [vmem:[#allocation2 + $0xf8] sm:$0xff]   ;;  %v2273_v44 = vld [vmem:[#allocation2 + $0x140] sm:$0xff]  }
  0x41   :  { %v2261_v29 = vld [vmem:[#allocation2 + $0x30] sm:$0xff]   ;;  %v2265_v35 = vld [vmem:[#allocation2 + $0x38] sm:$0xff]   ;;  %v2274_v47 = vld [vmem:[#allocation2 + $0x1c0] sm:$0xff]  }
  0x42   :  { %2030 = vmatpush3.bf16.msra.mxu0 %v2245_v10  ;;  %v2262_v30 = vld [vmem:[#allocation2 + $0xb0] sm:$0xff]   ;;  %v2266_v36 = vld [vmem:[#allocation2 + $0xb8] sm:$0xff]   ;;  %v2275_v50 = vld [vmem:[#allocation2 + $0x100] sm:$0xff]  }
  0x43   :  { %2052 = vmatpush3.bf16.msra.mxu1 %v2246_v11  ;;  %2031 = vmatprep.subr.bf16.mxu0 %v2247_v12  ;;  %v2267_v38 = vld [vmem:[%s2665_s0] ss:$16 sps:$4 sm:$0xff]   ;;  %v2271_v40 = vld [vmem:[%s2665_s0 + $0x4] ss:$16 sps:$4 sm:$0xff]   ;;  %v2277_v56 = vld [vmem:[#allocation2 + $0x148] sm:$0xff]  }
  0x44   :  { %2053 = vmatprep.subr.bf16.mxu1 %v2248_v13  ;;  %v2269_v39 = vld [vmem:[%s2665_s0 + $0x20] ss:$16 sps:$4 sm:$0xff]   ;;  %v2272_v41 = vld [vmem:[%s2665_s0 + $0x24] ss:$16 sps:$4 sm:$0xff]   ;;  %v105_v42 = vrot.slane %v2267_v38, %v2512_v37  ;;  %v112_v45 = vrot.slane %v2271_v40, %v2512_v37  ;;  %v2278_v59 = vld [vmem:[#allocation2 + $0x1c8] sm:$0xff]  }
  0x45   :  { %v119_v43 = vrot.slane %v2269_v39, %v2512_v37  ;;  %v126_v46 = vrot.slane %v2272_v41, %v2512_v37  ;;  %v2276_v53 = vld [vmem:[#allocation2 + $0x180] sm:$0xff]   ;;  %v2279_v60 = vld [vmem:[#allocation2 + $0x108] sm:$0xff]   ;;  %v2281_v62 = vld [vmem:[#allocation2 + $0x150] sm:$0xff]  }
  0x46   :  { %2032 = vmatpush3.bf16.msra.mxu0 %v2249_v14  ;;  %v2280_v61 = vld [vmem:[#allocation2 + $0x188] sm:$0xff]   ;;  %v2282_v63 = vld [vmem:[#allocation2 + $0x1d0] sm:$0xff]   ;;  %v2285_v2 = vld [vmem:[#allocation2 + $0x158] sm:$0xff]  }
  0x47   :  { %2054 = vmatpush3.bf16.msra.mxu1 %v2250_v15  ;;  %2033 = vmatprep.subr.bf16.mxu0 %v2251_v16  ;;  %v128_v48 = vcombine.high %v105_v42, %v119_v43  ;;  %v127_v49 = vcombine.low %v105_v42, %v119_v43  ;;  %v130_v51 = vcombine.high %v112_v45, %v126_v46  ;;  %v2283_v0 = vld [vmem:[#allocation2 + $0x110] sm:$0xff]   ;;  %v2286_v3 = vld [vmem:[#allocation2 + $0x1d8] sm:$0xff]   ;;  %v2289_v6 = vld [vmem:[#allocation2 + $0x160] sm:$0xff]  }
  0x48   :  { %2055 = vmatprep.subr.bf16.mxu1 %v2252_v17  ;;  %v129_v52 = vcombine.low %v112_v45, %v126_v46  ;;  %v2284_v1 = vld [vmem:[#allocation2 + $0x190] sm:$0xff]   ;;  %v2287_v4 = vld [vmem:[#allocation2 + $0x118] sm:$0xff]   ;;  %v2290_v7 = vld [vmem:[#allocation2 + $0x1e0] sm:$0xff]  }
  0x49   :  { %v176_v54 = vpack.c.bf16 %v128_v48, %v128_v48  ;;  %v175_v55 = vpack.c.bf16 %v127_v49, %v127_v49  ;;  %v178_v57 = vpack.c.bf16 %v130_v51, %v130_v51  ;;  %v2288_v5 = vld [vmem:[#allocation2 + $0x198] sm:$0xff]   ;;  %v2291_v8 = vld [vmem:[#allocation2 + $0x120] sm:$0xff]   ;;  %v2293_v10 = vld [vmem:[#allocation2 + $0x168] sm:$0xff]  }
  0x4a   :  { %2034 = vmatpush3.bf16.msra.mxu0 %v2253_v18  ;;  %v177_v58 = vpack.c.bf16 %v129_v52, %v129_v52  ;;  %v2292_v9 = vld [vmem:[#allocation2 + $0x1a0] sm:$0xff]   ;;  %v2294_v11 = vld [vmem:[#allocation2 + $0x1e8] sm:$0xff]   ;;  %v2297_v14 = vld [vmem:[#allocation2 + $0x170] sm:$0xff]  }
  0x4b   :  { %2056 = vmatpush3.bf16.msra.mxu1 %v2254_v19  ;;  %2035 = vmatprep.subr.bf16.mxu0 %v2255_v20  ;;  %v2295_v12 = vld [vmem:[#allocation2 + $0x128] sm:$0xff]   ;;  %v2298_v15 = vld [vmem:[#allocation2 + $0x1f0] sm:$0xff]   ;;  %v2301_v18 = vld [vmem:[#allocation2 + $0x178] sm:$0xff]  }
  0x4c   :  { %2057 = vmatprep.subr.bf16.mxu1 %v2256_v21  ;;  %734 = vmatprep.mubr.bf16.mxu0 %v176_v54  ;;  %v2296_v13 = vld [vmem:[#allocation2 + $0x1a8] sm:$0xff]   ;;  %v2299_v16 = vld [vmem:[#allocation2 + $0x130] sm:$0xff]   ;;  %v2302_v19 = vld [vmem:[#allocation2 + $0x1f8] sm:$0xff]  }
  0x4d   :  { %774 = vmatprep.mubr.bf16.mxu1 %v178_v57  ;;  %v2300_v17 = vld [vmem:[#allocation2 + $0x1b0] sm:$0xff]   ;;  %v2303_v20 = vld [vmem:[#allocation2 + $0x138] sm:$0xff]   ;;  %v864_v40 = vld [vmem:[#allocation4 + $0x8] sm:$0xff] }
  0x4e   :  { %2036 = vmatpush3.bf16.msra.mxu0 %v2257_v22  ;;  %v2304_v21 = vld [vmem:[#allocation2 + $0x1b8] sm:$0xff]   ;;  %v863_v42 = vld [vmem:[#allocation4] sm:$0xff]  ;;  %v868_v45 = vld [vmem:[#allocation4 + $0x28] sm:$0xff] }
  0x4f   :  { %2058 = vmatpush3.bf16.msra.mxu1 %v2258_v23  ;;  %2037 = vmatprep.subr.bf16.mxu0 %v2259_v27  ;;  %v2305_v22 = vld [vmem:[%s2665_s0 + $0x8] ss:$16 sps:$4 sm:$0xff]   ;;  %v2309_v24 = vld [vmem:[%s2665_s0 + $0xc] ss:$16 sps:$4 sm:$0xff]   ;;  %v867_v49 = vld [vmem:[#allocation4 + $0x20] sm:$0xff] }
  0x50   :  { %2059 = vmatprep.subr.bf16.mxu1 %v2260_v28  ;;  %v2307_v23 = vld [vmem:[%s2665_s0 + $0x28] ss:$16 sps:$4 sm:$0xff]   ;;  %v2310_v25 = vld [vmem:[%s2665_s0 + $0x2c] ss:$16 sps:$4 sm:$0xff]   ;;  %v141_v26 = vrot.slane %v2305_v22, %v2512_v37  ;;  %v148_v28 = vrot.slane %v2309_v24, %v2512_v37  ;;  %v893_v22 = vld [vmem:[#allocation4 + $0xf0] sm:$0xff]  ;;  %v2409_v24 = vmov 0.0  }
  0x51   :  { %v155_v27 = vrot.slane %v2307_v23, %v2512_v37  ;;  %v866_v41 = vld [vmem:[#allocation4 + $0x18] sm:$0xff]  ;;  %v872_v51 = vld [vmem:[#allocation4 + $0x48] sm:$0xff] }
  0x52   :  { %2038 = vmatpush3.bf16.msra.mxu0 %v2261_v29  ;;  %v162_v29 = vrot.slane %v2310_v25, %v2512_v37  ;;  %v2165_v43 = vpack.c.bf16 %v866_v41, %v864_v40  ;;  %v870_v46 = vld [vmem:[#allocation4 + $0x38] sm:$0xff]  ;;  %v876_v57 = vld [vmem:[#allocation4 + $0x68] sm:$0xff]  ;;  %v984_v25 = vld [vmem:[%s2671_s6] sm:$0xff] }
  0x53   :  { %2060 = vmatpush3.bf16.msra.mxu1 %v2262_v30  ;;  %2039 = vmatprep.subr.bf16.mxu0 %v2263_v33  ;;  %v164_v30 = vcombine.high %v141_v26, %v155_v27  ;;  %v163_v31 = vcombine.low %v141_v26, %v155_v27  ;;  %v2169_v48 = vpack.c.bf16 %v870_v46, %v868_v45  ;;  %v874_v52 = vld [vmem:[#allocation4 + $0x58] sm:$0xff]  ;;  %v985_v26 = vld [vmem:[%s2671_s6 + $0x8] sm:$0xff]  ;;  %v986_v27 = vld [vmem:[%s2671_s6 + $0x10] sm:$0xff] }
  0x54   :  { %2061 = vmatprep.subr.bf16.mxu1 %v2264_v34  ;;  %v166_v33 = vcombine.high %v148_v28, %v162_v29  ;;  %v165_v34 = vcombine.low %v148_v28, %v162_v29  ;;  %v2173_v54 = vpack.c.bf16 %v874_v52, %v872_v51  ;;  %v2410_v28 = vmov 0.0|0.0  }
  0x55   :  { %v2198_v29 = vpack.c.bf16 %v985_v26, %v984_v25  ;;  %v1095_v26 = vld [vmem:[#allocation6 + $0x80] sm:$0xff] }
  0x56   :  { %2040 = vmatpush3.bf16.msra.mxu0 %v2265_v35  ;;  %v180_v35 = vpack.c.bf16 %v164_v30, %v164_v30  ;;  %v182_v38 = vpack.c.bf16 %v166_v33, %v166_v33  ;;  %v181_v39 = vpack.c.bf16 %v165_v34, %v165_v34  ;;  %v987_v30 = vld [vmem:[%s2671_s6 + $0x18] sm:$0xff] }
  0x57   :  { %2062 = vmatpush3.bf16.msra.mxu1 %v2266_v36  ;;  %2069 = vmatprep.subr.bf16.mxu0 %v2273_v44  ;;  %v179_v36 = vpack.c.bf16 %v163_v31, %v163_v31  ;;  %v865_v44 = vld [vmem:[#allocation4 + $0x10] sm:$0xff]  ;;  %v2201_v31 = vpack.c.bf16 %v987_v30, %v986_v27  ;;  %v1099_v27 = vld [vmem:[#allocation6 + $0xa0] sm:$0xff] }
  0x58   :  { %2091 = vmatprep.subr.bf16.mxu1 %v2274_v47  ;;  %v2167_v47 = vpack.c.bf16 %v865_v44, %v863_v42  ;;  %v1103_v30 = vld [vmem:[#allocation6 + $0xc0] sm:$0xff] }
  0x59   :  { %735 = vmatmul.mubr.bf16.vlgmr.msra.gmra.mrb[0].mxu0 %v175_v55  ;;  %v871_v55 = vld [vmem:[#allocation4 + $0x40] sm:$0xff] }
  0x5a   :  { %775 = vmatmul.mubr.bf16.vlgmr.msra.gmra.mrb[0].mxu1 %v177_v58  ;;  %2070 = vmatpush3.bf16.msra.mxu0 %v2275_v50  ;;  %v869_v50 = vld [vmem:[#allocation4 + $0x30] sm:$0xff]  ;;  %v878_v58 = vld [vmem:[#allocation4 + $0x78] sm:$0xff] }
  0x5b   :  { %2092 = vmatpush3.bf16.msra.mxu1 %v2276_v53  ;;  %2071 = vmatprep.subr.bf16.mxu0 %v2277_v56  ;;  %v2171_v53 = vpack.c.bf16 %v869_v50, %v867_v49  ;;  %v873_v56 = vld [vmem:[#allocation4 + $0x50] sm:$0xff] }
  0x5c   :  { %2093 = vmatprep.subr.bf16.mxu1 %v2278_v59  ;;  %814 = vmatprep.mubr.bf16.mxu0 %v180_v35  ;;  %v2175_v59 = vpack.c.bf16 %v873_v56, %v871_v55  ;;  %v1893_v35 = vld [vmem:[%s2668_s3] ss:$0 sm:$0xff] }
  0x5d   :  { %854 = vmatprep.mubr.bf16.mxu1 %v182_v38 }
  0x5e   :  { %2072 = vmatpush3.bf16.msra.mxu0 %v2279_v60  ;;  %v2177_v60 = vpack.c.bf16 %v878_v58, %v876_v57 }
  0x5f   :  { %2094 = vmatpush3.bf16.msra.mxu1 %v2280_v61  ;;  %2073 = vmatprep.subr.bf16.mxu0 %v2281_v62  ;;  %v875_v61 = vld [vmem:[#allocation4 + $0x60] sm:$0xff]  ;;  %v877_v62 = vld [vmem:[#allocation4 + $0x70] sm:$0xff] }
  0x60   :  { %2095 = vmatprep.subr.bf16.mxu1 %v2282_v63  ;;  %v880_v63 = vld [vmem:[#allocation4 + $0x88] sm:$0xff] }
  0x62   :  { %2074 = vmatpush3.bf16.msra.mxu0 %v2283_v0  ;;  %v882_v0 = vld [vmem:[#allocation4 + $0x98] sm:$0xff] }
  0x63   :  { %2096 = vmatpush3.bf16.msra.mxu1 %v2284_v1  ;;  %2075 = vmatprep.subr.bf16.mxu0 %v2285_v2  ;;  %v2179_v1 = vpack.c.bf16 %v877_v62, %v875_v61  ;;  %v2181_v2 = vpack.c.bf16 %v882_v0, %v880_v63  ;;  %v989_v61 = vld [vmem:[%s2671_s6 + $0x28] sm:$0xff]  ;;  %v990_v63 = vld [vmem:[%s2671_s6 + $0x30] sm:$0xff]  ;;  %v991_v0 = vld [vmem:[%s2671_s6 + $0x38] sm:$0xff] }
  0x64   :  { %2097 = vmatprep.subr.bf16.mxu1 %v2286_v3  ;;  %v879_v3 = vld [vmem:[#allocation4 + $0x80] sm:$0xff] }
  0x66   :  { %2076 = vmatpush3.bf16.msra.mxu0 %v2287_v4  ;;  %v881_v4 = vld [vmem:[#allocation4 + $0x90] sm:$0xff] }
  0x67   :  { %2098 = vmatpush3.bf16.msra.mxu1 %v2288_v5  ;;  %2077 = vmatprep.subr.bf16.mxu0 %v2289_v6  ;;  %v884_v5 = vld [vmem:[#allocation4 + $0xa8] sm:$0xff]  ;;  %v886_v6 = vld [vmem:[#allocation4 + $0xb8] sm:$0xff] }
  0x68   :  { %2099 = vmatprep.subr.bf16.mxu1 %v2290_v7  ;;  %v2183_v7 = vpack.c.bf16 %v881_v4, %v879_v3  ;;  %v993_v3 = vld [vmem:[%s2671_s6 + $0x48] sm:$0xff] }
  0x6a   :  { %2078 = vmatpush3.bf16.msra.mxu0 %v2291_v8  ;;  %v2185_v8 = vpack.c.bf16 %v886_v6, %v884_v5  ;;  %v994_v5 = vld [vmem:[%s2671_s6 + $0x50] sm:$0xff]  ;;  %v995_v6 = vld [vmem:[%s2671_s6 + $0x58] sm:$0xff] }
  0x6b   :  { %2100 = vmatpush3.bf16.msra.mxu1 %v2292_v9  ;;  %2079 = vmatprep.subr.bf16.mxu0 %v2293_v10  ;;  %v883_v9 = vld [vmem:[#allocation4 + $0xa0] sm:$0xff]  ;;  %v885_v10 = vld [vmem:[#allocation4 + $0xb0] sm:$0xff] }
  0x6c   :  { %2101 = vmatprep.subr.bf16.mxu1 %v2294_v11  ;;  %v2187_v11 = vpack.c.bf16 %v885_v10, %v883_v9  ;;  %v997_v9 = vld [vmem:[%s2671_s6 + $0x68] sm:$0xff]  ;;  %v998_v10 = vld [vmem:[%s2671_s6 + $0x70] sm:$0xff] }
  0x6e   :  { %2080 = vmatpush3.bf16.msra.mxu0 %v2295_v12  ;;  %v888_v12 = vld [vmem:[#allocation4 + $0xc8] sm:$0xff] }
  0x6f   :  { %2102 = vmatpush3.bf16.msra.mxu1 %v2296_v13  ;;  %2081 = vmatprep.subr.bf16.mxu0 %v2297_v14  ;;  %v890_v13 = vld [vmem:[#allocation4 + $0xd8] sm:$0xff] }
  0x70   :  { %2103 = vmatprep.subr.bf16.mxu1 %v2298_v15  ;;  %v2189_v14 = vpack.c.bf16 %v890_v13, %v888_v12  ;;  %v887_v15 = vld [vmem:[#allocation4 + $0xc0] sm:$0xff]  ;;  %v999_v12 = vld [vmem:[%s2671_s6 + $0x78] sm:$0xff] }
  0x71   :  { %v2219_v13 = vpack.c.bf16 %v999_v12, %v998_v10  ;;  %v1112_v12 = vld [vmem:[#allocation6 + $0x108] sm:$0xff] }
  0x72   :  { %2082 = vmatpush3.bf16.msra.mxu0 %v2299_v16  ;;  %v889_v16 = vld [vmem:[#allocation4 + $0xd0] sm:$0xff] }
  0x73   :  { %2104 = vmatpush3.bf16.msra.mxu1 %v2300_v17  ;;  %2083 = vmatprep.subr.bf16.mxu0 %v2301_v18  ;;  %v2191_v17 = vpack.c.bf16 %v889_v16, %v887_v15  ;;  %v892_v18 = vld [vmem:[#allocation4 + $0xe8] sm:$0xff]  ;;  %v1083_v15 = vld [vmem:[#allocation6 + $0x20] sm:$0xff] }
  0x74   :  { %2105 = vmatprep.subr.bf16.mxu1 %v2302_v19  ;;  %v894_v19 = vld [vmem:[#allocation4 + $0xf8] sm:$0xff]  ;;  %v2607_v16 = vld [vmem:[#allocation6 + $0x8] sm:$0xff] }
  0x76   :  { %2084 = vmatpush3.bf16.msra.mxu0 %v2303_v20  ;;  %v2193_v20 = vpack.c.bf16 %v894_v19, %v892_v18  ;;  %v2609_v19 = vld [vmem:[#allocation6 + $0x28] sm:$0xff] }
  0x77   :  { %2106 = vmatpush3.bf16.msra.mxu1 %v2304_v21  ;;  %2166 = vmatprep.subr.bf16.mxu0 %v2165_v43  ;;  %v891_v21 = vld [vmem:[#allocation4 + $0xe0] sm:$0xff] }
  0x78   :  { %v2195_v23 = vpack.c.bf16 %v893_v22, %v891_v21  ;;  %2197 = vmatprep.subr.bf16.mxu1 %v2410_v28  ;;  %v1091_v21 = vld [vmem:[#allocation6 + $0x60] sm:$0xff]  ;;  %v1961_v22 = vcombine.low %v2607_v16, %v2609_v19 }
  0x79   :  { %815 = vmatmul.mubr.bf16.vlgmr.msra.gmra.mrb[4].mxu0 %v179_v36 }
  0x7a   :  { %855 = vmatmul.mubr.bf16.vlgmr.msra.gmra.mrb[4].mxu1 %v181_v39  ;;  %2168 = vmatpush1.bf16.msra.mxu0 %v2167_v47 }
  0x7b   :  { %2170 = vmatprep.subr.bf16.mxu0 %v2169_v48  ;;  %971 = vmatprep.mubr.f32.mxu0 %v2409_v24 }
  0x7c   :  { %2199 = vmatpush3.bf16.msra.mxu1 %v2198_v29  ;;  %2162 = vmatprep.mubr.msk.f32.mxu1 %vm2411_vm0, %v2409_v24  ;;  %v1975_v29 = vcombine.low %v1095_v26, %v1099_v27 }
  0x7d   :  { %2200 = vmatprep.subr.bf16.mxu1 %v2410_v28 }
  0x7e   :  { %2172 = vmatpush1.bf16.msra.mxu0 %v2171_v53 }
  0x7f   :  { %2174 = vmatprep.subr.bf16.mxu0 %v2173_v54 }
  0x80   :  { %2202 = vmatpush3.bf16.msra.mxu1 %v2201_v31  ;;  %v1107_v31 = vld [vmem:[#allocation6 + $0xe0] sm:$0xff] }
  0x81   :  { %2203 = vmatprep.subr.bf16.mxu1 %v2410_v28 }
  0x82   :  { %2176 = vmatpush1.bf16.msra.mxu0 %v2175_v59 }
  0x83   :  { %2178 = vmatprep.subr.bf16.mxu0 %v2177_v60  ;;  %v988_v60 = vld [vmem:[%s2671_s6 + $0x20] sm:$0xff] }
  0x84   :  { %v2204_v62 = vpack.c.bf16 %v989_v61, %v988_v60  ;;  %v981_v61 = vld [vmem:[%s2666_s1] sm:$0xff] }
  0x86   :  { %2180 = vmatpush1.bf16.msra.mxu0 %v2179_v1  ;;  %2205 = vmatpush3.bf16.msra.mxu1 %v2204_v62  ;;  %v2207_v1 = vpack.c.bf16 %v991_v0, %v990_v63  ;;  %v1088_v63 = vld [vmem:[#allocation6 + $0x48] sm:$0xff] }
  0x87   :  { %2182 = vmatprep.subr.bf16.mxu0 %v2181_v2  ;;  %2206 = vmatprep.subr.bf16.mxu1 %v2410_v28  ;;  %v992_v2 = vld [vmem:[%s2671_s6 + $0x40] sm:$0xff]  ;;  %v1092_v0 = vld [vmem:[#allocation6 + $0x68] sm:$0xff] }
  0x88   :  { %v2210_v4 = vpack.c.bf16 %v993_v3, %v992_v2  ;;  %v1970_v3 = vcombine.high %v1088_v63, %v1092_v0 }
  0x8a   :  { %2184 = vmatpush1.bf16.msra.mxu0 %v2183_v7  ;;  %2208 = vmatpush3.bf16.msra.mxu1 %v2207_v1  ;;  %v2213_v7 = vpack.c.bf16 %v995_v6, %v994_v5  ;;  %v1100_v5 = vld [vmem:[#allocation6 + $0xa8] sm:$0xff]  ;;  %v1969_v6 = vcombine.low %v1088_v63, %v1092_v0 }
  0x8b   :  { %2186 = vmatprep.subr.bf16.mxu0 %v2185_v8  ;;  %2209 = vmatprep.subr.bf16.mxu1 %v2410_v28  ;;  %v996_v8 = vld [vmem:[%s2671_s6 + $0x60] sm:$0xff] }
  0x8e   :  { %2188 = vmatpush1.bf16.msra.mxu0 %v2187_v11  ;;  %2211 = vmatpush3.bf16.msra.mxu1 %v2210_v4  ;;  %v2216_v11 = vpack.c.bf16 %v997_v9, %v996_v8  ;;  %v1096_v4 = vld [vmem:[#allocation6 + $0x88] sm:$0xff] }
  0x8f   :  { %2190 = vmatprep.subr.bf16.mxu0 %v2189_v14  ;;  %2212 = vmatprep.subr.bf16.mxu1 %v2410_v28  ;;  %v1079_v14 = vld [vmem:[#allocation6] sm:$0xff]  ;;  %v1104_v8 = vld [vmem:[#allocation6 + $0xc8] sm:$0xff]  ;;  %v1977_v10 = vcombine.low %v1096_v4, %v1100_v5 }
  0x90   :  { %v1960_v18 = vcombine.high %v1079_v14, %v1083_v15  ;;  %v1108_v9 = vld [vmem:[#allocation6 + $0xe8] sm:$0xff] }
  0x92   :  { %2192 = vmatpush1.bf16.msra.mxu0 %v2191_v17  ;;  %2214 = vmatpush3.bf16.msra.mxu1 %v2213_v7  ;;  %v1959_v17 = vcombine.low %v1079_v14, %v1083_v15  ;;  %v1978_v7 = vcombine.high %v1096_v4, %v1100_v5  ;;  %v1985_v14 = vcombine.low %v1104_v8, %v1108_v9  ;;  %v1106_v4 = vld [vmem:[#allocation6 + $0xd8] sm:$0xff] }
  0x93   :  { %2194 = vmatprep.subr.bf16.mxu0 %v2193_v20  ;;  %2215 = vmatprep.subr.bf16.mxu1 %v2410_v28  ;;  %v1087_v20 = vld [vmem:[#allocation6 + $0x40] sm:$0xff]  ;;  %v1110_v5 = vld [vmem:[#allocation6 + $0xf8] sm:$0xff] }
  0x94   :  { %v1968_v24 = vcombine.high %v1087_v20, %v1091_v21  ;;  %v1967_v25 = vcombine.low %v1087_v20, %v1091_v21  ;;  %v1128_v20 = vld [vmem:[#allocation6 + $0x188] sm:$0xff] }
  0x95   :  { %v1132_v21 = vld [vmem:[#allocation6 + $0x1a8] sm:$0xff] }
  0x96   :  { %2196 = vmatpush1.bf16.msra.mxu0 %v2195_v23  ;;  %2217 = vmatpush3.bf16.msra.mxu1 %v2216_v11  ;;  %v1962_v23 = vcombine.high %v2607_v16, %v2609_v19  ;;  %v1986_v11 = vcombine.high %v1104_v8, %v1108_v9  ;;  %v1990_v9 = vcombine.high %v1106_v4, %v1110_v5 }
  0x97   :  { %2218 = vmatprep.subr.bf16.mxu1 %v2410_v28  ;;  %1505 = vmatprep.subr.bf16.mxu0 %v1960_v18  ;;  %v1976_v28 = vcombine.high %v1095_v26, %v1099_v27  ;;  %v1124_v18 = vld [vmem:[#allocation6 + $0x168] sm:$0xff]  ;;  %v1139_v26 = vld [vmem:[#allocation6 + $0x1e0] sm:$0xff] }
  0x98   :  { %v1136_v27 = vld [vmem:[#allocation6 + $0x1c8] sm:$0xff] }
  0x9a   :  { %2220 = vmatpush3.bf16.msra.mxu1 %v2219_v13  ;;  %v1116_v13 = vld [vmem:[#allocation6 + $0x128] sm:$0xff] }
  0x9b   :  { %1546 = vmatprep.subr.bf16.mxu1 %v1962_v23  ;;  %v1994_v15 = vcombine.high %v1112_v12, %v1116_v13  ;;  %v1993_v16 = vcombine.low %v1112_v12, %v1116_v13  ;;  %v2010_v23 = vcombine.high %v1128_v20, %v1132_v21  ;;  %v1114_v12 = vld [vmem:[#allocation6 + $0x118] sm:$0xff] }
  0x9c   :  { %v1118_v13 = vld [vmem:[#allocation6 + $0x138] sm:$0xff] }
 0x12c   :  { %v2041_v33 = vpop.f32.mrb[0].mxu0 }
 0x12d   :  { %v2063_v34 = vpop.f32.mrb[0].mxu1  ;;  %v2042_v36 = vpop.f32.mrb[1].mxu0 }
 0x12e   :  { %v2043_v38 = vadd.f32 %v2042_v36, %v2041_v33  ;;  %v2064_v39 = vpop.f32.mrb[1].mxu1  ;;  %v2044_v40 = vpop.f32.mrb[2].mxu0  ;;  %v1984_v33 = vcombine.high %v1103_v30, %v1107_v31  ;;  %v1115_v36 = vld [vmem:[#allocation6 + $0x120] sm:$0xff] }
 0x12f   :  { %v2065_v41 = vadd.f32 %v2064_v39, %v2063_v34  ;;  %v2066_v42 = vpop.f32.mrb[2].mxu1  ;;  %v2045_v43 = vpop.f32.mrb[3].mxu0  ;;  %v1983_v34 = vcombine.low %v1103_v30, %v1107_v31  ;;  %v1119_v40 = vld [vmem:[#allocation6 + $0x140] sm:$0xff] }
 0x130   :  { %v737_v44 = vadd.f32 %v2043_v38, %v1893_v35  ;;  %v2067_v45 = vpop.f32.mrb[3].mxu1  ;;  %v1111_v35 = vld [vmem:[#allocation6 + $0x100] sm:$0xff] }
 0x131   :  { %v1992_v38 = vcombine.high %v1111_v35, %v1115_v36  ;;  %v1991_v39 = vcombine.low %v1111_v35, %v1115_v36  ;;  %v1131_v45 = vld [vmem:[#allocation6 + $0x1a0] sm:$0xff]  ;;  %v1085_v35 = vld [vmem:[#allocation6 + $0x30] sm:$0xff]  ;;  %v1082_v36 = vld [vmem:[#allocation6 + $0x18] sm:$0xff] }
 0x132   :  { %v777_v46 = vadd.f32 %v2065_v41, %v737_v44  ;;  %v1123_v41 = vld [vmem:[#allocation6 + $0x160] sm:$0xff] }
 0x133   :  { %v2000_v42 = vcombine.high %v1119_v40, %v1123_v41  ;;  %v1999_v43 = vcombine.low %v1119_v40, %v1123_v41  ;;  %v1127_v44 = vld [vmem:[#allocation6 + $0x180] sm:$0xff]  ;;  %v1086_v40 = vld [vmem:[#allocation6 + $0x38] sm:$0xff]  ;;  %v2412_v41 = vmov 0  }
 0x14c   :  { %v2085_v47 = vpop.f32.mrb[4].mxu0 }
 0x14d   :  { %v2107_v48 = vpop.f32.mrb[4].mxu1  ;;  %v2086_v49 = vpop.f32.mrb[5].mxu0 }
 0x14e   :  { %v2087_v50 = vadd.f32 %v2086_v49, %v2085_v47  ;;  %v2108_v51 = vpop.f32.mrb[5].mxu1  ;;  %v2088_v52 = vpop.f32.mrb[6].mxu0  ;;  %v2007_v47 = vcombine.low %v1127_v44, %v1131_v45  ;;  %v895_v49 = vld [vmem:[%s2670_s5] sm:$0x3] }
 0x14f   :  { %v2109_v53 = vadd.f32 %v2108_v51, %v2107_v48  ;;  %v2110_v54 = vpop.f32.mrb[6].mxu1  ;;  %v2089_v55 = vpop.f32.mrb[7].mxu0  ;;  %v899_v48 = vsub.s32 0, %v2509_v32 }
 0x150   :  { %v817_v56 = vadd.f32 %v2087_v50, %v777_v46  ;;  %v2111_v57 = vpop.f32.mrb[7].mxu1  ;;  %v2008_v46 = vcombine.high %v1127_v44, %v1131_v45  ;;  %v903_v50 = vsub.s32 1, %v2509_v32  ;;  %v1958_v44 = vld [vmem:[%s2672_s7] ss:$0 sm:$0xff] }
 0x151   :  { %v900_v51 = vrot.slane %v895_v49, %v899_v48 }
 0x152   :  { %v857_v58 = vadd.f32 %v2109_v53, %v817_v56  ;;  %v904_v52 = vrot.slane %v895_v49, %v903_v50  ;;  %v1089_v49 = vld [vmem:[#allocation6 + $0x50] sm:$0xff] }
 0x154   :  { %v862_v59 = vmax.f32 %v857_v58, 0.0 }
 0x156   :  { %972 = vmatmul.mubr.f32.vlgmr.msra.gmra.mrb[8].mxu0 %v862_v59 }
 0x157   :  { %1506 = vmatpush1.bf16.msra.mxu0 %v1959_v17  ;;  %v1120_v17 = vld [vmem:[#allocation6 + $0x148] sm:$0xff]  ;;  %1537 = vmatprep.mubr.bf16.mxu0 %v2412_v41 }
 0x158   :  { %1507 = vmatprep.subr.bf16.mxu0 %v1968_v24  ;;  %v2002_v19 = vcombine.high %v1120_v17, %v1124_v18  ;;  %v2009_v24 = vcombine.low %v1128_v20, %v1132_v21  ;;  %v1122_v20 = vld [vmem:[#allocation6 + $0x158] sm:$0xff] }
 0x159   :  { %v1126_v21 = vld [vmem:[#allocation6 + $0x178] sm:$0xff] }
 0x15b   :  { %1508 = vmatpush1.bf16.msra.mxu0 %v1967_v25  ;;  %v1135_v25 = vld [vmem:[#allocation6 + $0x1c0] sm:$0xff] }
 0x15c   :  { %1509 = vmatprep.subr.bf16.mxu0 %v1976_v28  ;;  %v2016_v28 = vcombine.high %v1135_v25, %v1139_v26  ;;  %v2015_v30 = vcombine.low %v1135_v25, %v1139_v26  ;;  %v2006_v25 = vcombine.high %v1122_v20, %v1126_v21  ;;  %v1129_v26 = vld [vmem:[#allocation6 + $0x190] sm:$0xff] }
 0x15f   :  { %1510 = vmatpush1.bf16.msra.mxu0 %v1975_v29  ;;  %v1140_v29 = vld [vmem:[#allocation6 + $0x1e8] sm:$0xff] }
 0x160   :  { %1511 = vmatprep.subr.bf16.mxu0 %v1984_v33  ;;  %v2017_v31 = vcombine.low %v1136_v27, %v1140_v29  ;;  %v2018_v33 = vcombine.high %v1136_v27, %v1140_v29  ;;  %v1133_v27 = vld [vmem:[#allocation6 + $0x1b0] sm:$0xff]  ;;  %v1134_v29 = vld [vmem:[#allocation6 + $0x1b8] sm:$0xff] }
 0x163   :  { %1512 = vmatpush1.bf16.msra.mxu0 %v1983_v34  ;;  %v1081_v34 = vld [vmem:[#allocation6 + $0x10] sm:$0xff] }
 0x164   :  { %1513 = vmatprep.subr.bf16.mxu0 %v1992_v38  ;;  %v1963_v38 = vcombine.low %v1081_v34, %v1085_v35 }
 0x167   :  { %1514 = vmatpush1.bf16.msra.mxu0 %v1991_v39  ;;  %v1964_v39 = vcombine.high %v1081_v34, %v1085_v35  ;;  %v1137_v35 = vld [vmem:[#allocation6 + $0x1d0] sm:$0xff] }
 0x168   :  { %1515 = vmatprep.subr.bf16.mxu0 %v2000_v42  ;;  %v1965_v42 = vcombine.low %v1082_v36, %v1086_v40 }
 0x16b   :  { %1516 = vmatpush1.bf16.msra.mxu0 %v1999_v43  ;;  %v1966_v43 = vcombine.high %v1082_v36, %v1086_v40  ;;  %v1141_v36 = vld [vmem:[#allocation6 + $0x1f0] sm:$0xff]  ;;  %v2011_v40 = vcombine.low %v1129_v26, %v1133_v27 }
 0x16c   :  { %1517 = vmatprep.subr.bf16.mxu0 %v2008_v46 }
 0x16f   :  { %1518 = vmatpush1.bf16.msra.mxu0 %v2007_v47 }
 0x170   :  { %1519 = vmatprep.subr.bf16.mxu0 %v2016_v28  ;;  %v1130_v28 = vld [vmem:[#allocation6 + $0x198] sm:$0xff] }
 0x171   :  { %v2014_v34 = vcombine.high %v1130_v28, %v1134_v29 }
 0x173   :  { %1520 = vmatpush1.bf16.msra.mxu0 %v2015_v30 }
 0x174   :  { %1587 = vmatprep.subr.bf16.mxu0 %v1964_v39  ;;  %v1142_v39 = vld [vmem:[#allocation6 + $0x1f8] sm:$0xff] }
 0x229   :  { %v973_v53 = vpop.f32.mrb[8].mxu0 }
 0x22a   :  { %v974_v54 = vadd.f32 %v973_v53, %v900_v51  ;;  %v975_v55 = vpop.f32.mrb[9].mxu0  ;;  %v1093_v51 = vld [vmem:[#allocation6 + $0x70] sm:$0xff]  ;;  %v1094_v53 = vld [vmem:[#allocation6 + $0x78] sm:$0xff] }
 0x22b   :  { %v976_v56 = vadd.f32 %v975_v55, %v904_v52  ;;  %v1090_v52 = vld [vmem:[#allocation6 + $0x58] sm:$0xff] }
 0x22c   :  { %v1973_v63 = vcombine.low %v1090_v52, %v1094_v53 }
 0x22d   :  { %v978_v57 = vmul.f32 0.5, %v976_v56  ;;  %v1799_v58 = vcombine.low %v974_v54, %v976_v56  ;;  %v1972_v56 = vcombine.high %v1089_v49, %v1093_v51 }
 0x22f   :  { %v979_v59 = vmul.f32 1.442695, %v978_v57  ;;  %2023 = vst.sshfl [vmem:[#allocation8] sm:$0x33 pattern:$0x76325410] %v1799_v58  ;;  %v1974_v57 = vcombine.high %v1090_v52, %v1094_v53 }
 0x230   :  { %v1097_v58 = vld [vmem:[#allocation6 + $0x90] sm:$0xff] }
 0x231   :  { %2311 = vpow2.f32 %v979_v59  ;;  %v1101_v59 = vld [vmem:[#allocation6 + $0xb0] sm:$0xff] }
 0x232   :  { %v1980_v0 = vcombine.high %v1097_v58, %v1101_v59 }
 0x236   :  { %v1863_v60 = vld [vmem:[#allocation8] sm:$0xf] }
 0x237   :  { %1864 = vst [vmem:[%s2676_s11] sm:$0xf] %v1863_v60  ;;  %v1098_v60 = vld [vmem:[#allocation6 + $0x98] sm:$0xff] }
 0x23b   :  { %v2312_v62 = vpop.eup %2311 }
 0x23c   :  { %v982_v1 = vmul.f32 %v2312_v62, %v981_v61  ;;  %v1102_v61 = vld [vmem:[#allocation6 + $0xb8] sm:$0xff]  ;;  %v1971_v62 = vcombine.low %v1089_v49, %v1093_v51  ;;  %v1159_v49 = vsub.s32 3, %v2509_v32 }
 0x23e   :  { %v983_v2 = vadd.f32 %v982_v1, %v974_v54  ;;  %v1982_v1 = vcombine.high %v1098_v60, %v1102_v61 }
 0x240   :  { %2163 = vmatmul.mubr.f32.vlgmr.msra.gmra.mrb[8].mxu1 %v983_v2  ;;  %v1105_v2 = vld [vmem:[#allocation6 + $0xd0] sm:$0xff] }
 0x241   :  { %1547 = vmatpush1.bf16.msra.mxu1 %v1961_v22  ;;  %v2001_v22 = vcombine.low %v1120_v17, %v1124_v18  ;;  %1578 = vmatprep.mubr.bf16.mxu1 %v2412_v41  ;;  %v1998_v18 = vcombine.high %v1114_v12, %v1118_v13 }
 0x242   :  { %1548 = vmatprep.subr.bf16.mxu1 %v1970_v3  ;;  %v1109_v3 = vld [vmem:[#allocation6 + $0xf0] sm:$0xff] }
 0x243   :  { %v1988_v8 = vcombine.high %v1105_v2, %v1109_v3 }
 0x245   :  { %1549 = vmatpush1.bf16.msra.mxu1 %v1969_v6  ;;  %v1979_v6 = vcombine.low %v1097_v58, %v1101_v59 }
 0x246   :  { %1550 = vmatprep.subr.bf16.mxu1 %v1978_v7  ;;  %v1981_v7 = vcombine.low %v1098_v60, %v1102_v61 }
 0x249   :  { %1551 = vmatpush1.bf16.msra.mxu1 %v1977_v10  ;;  %v1113_v10 = vld [vmem:[#allocation6 + $0x110] sm:$0xff] }
 0x24a   :  { %1552 = vmatprep.subr.bf16.mxu1 %v1986_v11  ;;  %v1117_v11 = vld [vmem:[#allocation6 + $0x130] sm:$0xff] }
 0x24b   :  { %v1996_v17 = vcombine.high %v1113_v10, %v1117_v11 }
 0x24d   :  { %1553 = vmatpush1.bf16.msra.mxu1 %v1985_v14  ;;  %v1987_v14 = vcombine.low %v1105_v2, %v1109_v3 }
 0x24e   :  { %1554 = vmatprep.subr.bf16.mxu1 %v1994_v15  ;;  %v1989_v15 = vcombine.low %v1106_v4, %v1110_v5 }
 0x251   :  { %1555 = vmatpush1.bf16.msra.mxu1 %v1993_v16  ;;  %v1121_v16 = vld [vmem:[#allocation6 + $0x150] sm:$0xff] }
 0x252   :  { %1556 = vmatprep.subr.bf16.mxu1 %v2002_v19  ;;  %v1125_v19 = vld [vmem:[#allocation6 + $0x170] sm:$0xff] }
 0x253   :  { %v2003_v30 = vcombine.low %v1121_v16, %v1125_v19 }
 0x255   :  { %1557 = vmatpush1.bf16.msra.mxu1 %v2001_v22  ;;  %v1995_v22 = vcombine.low %v1113_v10, %v1117_v11 }
 0x256   :  { %1558 = vmatprep.subr.bf16.mxu1 %v2010_v23  ;;  %v1997_v23 = vcombine.low %v1114_v12, %v1118_v13 }
 0x259   :  { %1559 = vmatpush1.bf16.msra.mxu1 %v2009_v24  ;;  %v2004_v24 = vcombine.high %v1121_v16, %v1125_v19 }
 0x25a   :  { %1560 = vmatprep.subr.bf16.mxu1 %v2018_v33  ;;  %v2012_v33 = vcombine.high %v1129_v26, %v1133_v27 }
 0x25d   :  { %1561 = vmatpush1.bf16.msra.mxu1 %v2017_v31  ;;  %v2005_v31 = vcombine.low %v1122_v20, %v1126_v21  ;;  %v1163_v21 = vsub.s32 4, %v2509_v32 }
 0x25e   :  { %1628 = vmatprep.subr.bf16.mxu1 %v1966_v43 }
 0x313   :  { %v1073_v45 = vpop.f32.mrb[8].mxu1 }
 0x314   :  { %v1074_v46 = vadd.f32 %v1958_v44, %v1073_v45  ;;  %v2164_v47 = vpop.f32.mrb[9].mxu1  ;;  %v2019_v44 = vcombine.low %v1137_v35, %v1141_v36 }
 0x315   :  { %v1143_v47 = vld [vmem:[%s2674_s9] sm:$0xff] }
 0x316   :  { %v1077_v54 = vmax.f32 %v1074_v46, 0.0  ;;  %v1155_v46 = vsub.s32 2, %v2509_v32  ;;  %v1148_v51 = vrot.slane %v1143_v47, %v899_v48  ;;  %v1152_v53 = vrot.slane %v1143_v47, %v903_v50 }
 0x317   :  { %v1164_v26 = vrot.slane %v1143_v47, %v1163_v21 }
 0x318   :  { %v2636_v55 = vpack.c.bf16 %v1077_v54, %v1077_v54  ;;  %v1156_v52 = vrot.slane %v1143_v47, %v1155_v46  ;;  %v1160_v54 = vrot.slane %v1143_v47, %v1159_v49 }
 0x31a   :  { %1538 = vmatmul.mubr.bf16.vlgmr.msra.gmra.mrb[12].mxu0 %v2636_v55  ;;  %1579 = vmatmul.mubr.bf16.vlgmr.msra.gmra.mrb[12].mxu1 %v2636_v55 }
 0x31b   :  { %1588 = vmatpush1.bf16.msra.mxu0 %v1963_v38  ;;  %1629 = vmatpush1.bf16.msra.mxu1 %v1965_v42  ;;  %v1138_v38 = vld [vmem:[#allocation6 + $0x1d8] sm:$0xff]  ;;  %v2020_v42 = vcombine.high %v1137_v35, %v1141_v36 }
 0x31c   :  { %1589 = vmatprep.subr.bf16.mxu0 %v1972_v56  ;;  %1630 = vmatprep.subr.bf16.mxu1 %v1974_v57  ;;  %v2022_v43 = vcombine.high %v1138_v38, %v1142_v39  ;;  %v2021_v45 = vcombine.low %v1138_v38, %v1142_v39 }
 0x31d   :  { %1619 = vmatprep.mubr.bf16.mxu0 %v2412_v41  ;;  %1660 = vmatprep.mubr.bf16.mxu1 %v2412_v41  ;;  %v2013_v41 = vcombine.low %v1130_v28, %v1134_v29 }
 0x31f   :  { %1590 = vmatpush1.bf16.msra.mxu0 %v1971_v62  ;;  %1631 = vmatpush1.bf16.msra.mxu1 %v1973_v63 }
 0x320   :  { %1591 = vmatprep.subr.bf16.mxu0 %v1980_v0  ;;  %1632 = vmatprep.subr.bf16.mxu1 %v1982_v1 }
 0x323   :  { %1592 = vmatpush1.bf16.msra.mxu0 %v1979_v6  ;;  %1633 = vmatpush1.bf16.msra.mxu1 %v1981_v7 }
 0x324   :  { %1593 = vmatprep.subr.bf16.mxu0 %v1988_v8  ;;  %1634 = vmatprep.subr.bf16.mxu1 %v1990_v9 }
 0x327   :  { %1594 = vmatpush1.bf16.msra.mxu0 %v1987_v14  ;;  %1635 = vmatpush1.bf16.msra.mxu1 %v1989_v15 }
 0x328   :  { %1595 = vmatprep.subr.bf16.mxu0 %v1996_v17  ;;  %1636 = vmatprep.subr.bf16.mxu1 %v1998_v18 }
 0x32b   :  { %1596 = vmatpush1.bf16.msra.mxu0 %v1995_v22  ;;  %1637 = vmatpush1.bf16.msra.mxu1 %v1997_v23  ;;  %v1171_v22 = vsub.s32 6, %v2509_v32  ;;  %v1167_v23 = vsub.s32 5, %v2509_v32 }
 0x32c   :  { %1597 = vmatprep.subr.bf16.mxu0 %v2004_v24  ;;  %1638 = vmatprep.subr.bf16.mxu1 %v2006_v25  ;;  %v1175_v24 = vsub.s32 7, %v2509_v32 }
 0x32d   :  { %v1172_v27 = vrot.slane %v1143_v47, %v1171_v22  ;;  %v1168_v28 = vrot.slane %v1143_v47, %v1167_v23 }
 0x32e   :  { %v1176_v29 = vrot.slane %v1143_v47, %v1175_v24 }
 0x32f   :  { %1598 = vmatpush1.bf16.msra.mxu0 %v2003_v30  ;;  %1639 = vmatpush1.bf16.msra.mxu1 %v2005_v31 }
 0x330   :  { %1599 = vmatprep.subr.bf16.mxu0 %v2012_v33  ;;  %1640 = vmatprep.subr.bf16.mxu1 %v2014_v34 }
 0x333   :  { %1600 = vmatpush1.bf16.msra.mxu0 %v2011_v40  ;;  %1641 = vmatpush1.bf16.msra.mxu1 %v2013_v41 }
 0x334   :  { %1601 = vmatprep.subr.bf16.mxu0 %v2020_v42  ;;  %1642 = vmatprep.subr.bf16.mxu1 %v2022_v43 }
 0x337   :  { %1602 = vmatpush1.bf16.msra.mxu0 %v2019_v44  ;;  %1643 = vmatpush1.bf16.msra.mxu1 %v2021_v45 }
 0x33a   :  { %1620 = vmatmul.mubr.bf16.vlgmr.msra.gmra.mrb[16].mxu0 %v2636_v55  ;;  %1661 = vmatmul.mubr.bf16.vlgmr.msra.gmra.mrb[16].mxu1 %v2636_v55 }
 0x3ed   :  { %v1539_v56 = vpop.f32.mrb[12].mxu0  ;;  %v1580_v57 = vpop.f32.mrb[12].mxu1 }
 0x3ee   :  { %v1540_v58 = vadd.f32 %v1539_v56, %v1148_v51  ;;  %v1581_v55 = vadd.f32 %v1580_v57, %v1156_v52  ;;  %v1541_v59 = vpop.f32.mrb[13].mxu0  ;;  %v1582_v60 = vpop.f32.mrb[13].mxu1 }
 0x3ef   :  { %v1542_v61 = vadd.f32 %v1541_v59, %v1152_v53  ;;  %v1583_v62 = vadd.f32 %v1582_v60, %v1160_v54  ;;  %v1543_v63 = vpop.f32.mrb[14].mxu0  ;;  %v1584_v0 = vpop.f32.mrb[14].mxu1 }
 0x3f0   :  { %v1669_v1 = vmul.f32 0.5, %v1540_v58  ;;  %v1671_v2 = vmul.f32 0.5, %v1581_v55  ;;  %v1544_v3 = vpop.f32.mrb[15].mxu0  ;;  %v1585_v4 = vpop.f32.mrb[15].mxu1 }
 0x3f1   :  { %v1670_v48 = vmul.f32 0.5, %v1542_v61  ;;  %v1672_v5 = vmul.f32 0.5, %v1583_v62 }
 0x3f2   :  { %2313 = vtanh.f32 %v1669_v1 }
 0x3f3   :  { %2315 = vtanh.f32 %v1671_v2 }
 0x3f4   :  { %2317 = vtanh.f32 %v1670_v48 }
 0x3f5   :  { %2319 = vtanh.f32 %v1672_v5 }
 0x3fc   :  { %v2314_v50 = vpop.eup %2313 }
 0x3fd   :  { %v2316_v6 = vpop.eup %2315  ;;  %v1685_v7 = vmul.f32 0.5, %v2314_v50 }
 0x3fe   :  { %v2318_v8 = vpop.eup %2317  ;;  %v1687_v9 = vmul.f32 0.5, %v2316_v6 }
 0x3ff   :  { %v2320_v10 = vpop.eup %2319  ;;  %v1693_v11 = vadd.f32 0.5, %v1685_v7  ;;  %v1686_v12 = vmul.f32 0.5, %v2318_v8 }
 0x400   :  { %v1695_v13 = vadd.f32 0.5, %v1687_v9  ;;  %v1688_v14 = vmul.f32 0.5, %v2320_v10 }
 0x401   :  { %v1694_v15 = vadd.f32 0.5, %v1686_v12 }
 0x402   :  { %v1696_v17 = vadd.f32 0.5, %v1688_v14 }
 0x403   :  { %v1709_v18 = vcombine.low %v1693_v11, %v1694_v15 }
 0x404   :  { %v1711_v16 = vcombine.low %v1695_v13, %v1696_v17 }
 0x405   :  { %v1719_v19 = vrot.slane %v1709_v18, %v2512_v37 }
 0x406   :  { %v1733_v20 = vrot.slane %v1711_v16, %v2512_v37 }
 0x408   :  { %v1741_v25 = vcombine.low %v1719_v19, %v1733_v20 }
 0x40a   :  { %1840 = vst [vmem:[%s2675_s10] sm:$0xff] %v1741_v25 }
 0x40d   :  { %v1621_v30 = vpop.f32.mrb[16].mxu0  ;;  %v1662_v31 = vpop.f32.mrb[16].mxu1 }
 0x40e   :  { %v1622_v33 = vadd.f32 %v1621_v30, %v1164_v26  ;;  %v1663_v34 = vadd.f32 %v1662_v31, %v1172_v27  ;;  %v1623_v35 = vpop.f32.mrb[17].mxu0  ;;  %v1664_v36 = vpop.f32.mrb[17].mxu1 }
 0x40f   :  { %v1624_v38 = vadd.f32 %v1623_v35, %v1168_v28  ;;  %v1665_v39 = vadd.f32 %v1664_v36, %v1176_v29  ;;  %v1625_v40 = vpop.f32.mrb[18].mxu0  ;;  %v1666_v41 = vpop.f32.mrb[18].mxu1 }
 0x410   :  { %v1673_v32 = vmul.f32 0.5, %v1622_v33  ;;  %v1675_v42 = vmul.f32 0.5, %v1663_v34  ;;  %v1626_v43 = vpop.f32.mrb[19].mxu0  ;;  %v1667_v44 = vpop.f32.mrb[19].mxu1 }
 0x411   :  { %v1674_v45 = vmul.f32 0.5, %v1624_v38  ;;  %v1676_v46 = vmul.f32 0.5, %v1665_v39 }
 0x412   :  { %2321 = vtanh.f32 %v1673_v32 }
 0x413   :  { %2323 = vtanh.f32 %v1675_v42 }
 0x414   :  { %2325 = vtanh.f32 %v1674_v45 }
 0x415   :  { %2327 = vtanh.f32 %v1676_v46 }
 0x41c   :  { %v2322_v47 = vpop.eup %2321 }
 0x41d   :  { %v2324_v49 = vpop.eup %2323  ;;  %v1689_v51 = vmul.f32 0.5, %v2322_v47 }
 0x41e   :  { %v2326_v52 = vpop.eup %2325  ;;  %v1691_v53 = vmul.f32 0.5, %v2324_v49 }
 0x41f   :  { %v2328_v54 = vpop.eup %2327  ;;  %v1697_v56 = vadd.f32 0.5, %v1689_v51  ;;  %v1690_v57 = vmul.f32 0.5, %v2326_v52 }
 0x420   :  { %v1699_v58 = vadd.f32 0.5, %v1691_v53  ;;  %v1692_v55 = vmul.f32 0.5, %v2328_v54 }
 0x421   :  { %v1698_v59 = vadd.f32 0.5, %v1690_v57 }
 0x422   :  { %v1700_v60 = vadd.f32 0.5, %v1692_v55 }
 0x423   :  { %v1745_v61 = vcombine.low %v1697_v56, %v1698_v59 }
 0x424   :  { %v1747_v62 = vcombine.low %v1699_v58, %v1700_v60 }
 0x425   :  { %v1755_v63 = vrot.slane %v1745_v61, %v2512_v37 }
 0x426   :  { %v1769_v0 = vrot.slane %v1747_v62, %v2512_v37 }
 0x428   :  { %v1777_v1 = vcombine.low %v1755_v63, %v1769_v0 }
 0x42a   :  { %1842 = vst [vmem:[%s2675_s10 + $0x8] sm:$0xff] %v1777_v1 }
 0x42b   :  { %1883 = vsyncpa [#allocation3], 1 }
 0x42c   :  { %1884 = vsyncpa [#allocation5], 1 }

</bundles_post_ra>
